<compile_context>
chip_gen: v7x
topology: tpu7x:2x2x1
jax: 0.10.0
libtpu: 0.0.40
codegen_flags: <defaults>
</compile_context>

<pallas_src>
import math

import jax
import jax.numpy as jnp
from jax.experimental import pallas as pl
from jax.experimental.pallas import tpu as pltpu

EPS = 1e-5  # nn.BatchNorm2d default eps


# ---------------------------------------------------------------------------
# Pallas helpers
# ---------------------------------------------------------------------------
def _full_spec(shape):
    nd = len(shape)
    return pl.BlockSpec(tuple(shape), lambda i, _nd=nd: (0,) * _nd)


def _run_full(kernel, inputs, out_shape, out_dtype=jnp.float32, scratch_shapes=()):
    """Run `kernel` once with every operand as a single full-array VMEM block."""
    return pl.pallas_call(
        kernel,
        out_shape=jax.ShapeDtypeStruct(tuple(out_shape), out_dtype),
        grid=(1,),
        in_specs=[_full_spec(tuple(a.shape)) for a in inputs],
        out_specs=_full_spec(tuple(out_shape)),
        scratch_shapes=list(scratch_shapes),
        compiler_params=pltpu.CompilerParams(
            dimension_semantics=("arbitrary",)),
    )(*inputs)


# ---------------------------------------------------------------------------
# In-kernel building blocks (trace-time helpers)
# ---------------------------------------------------------------------------
def _bn_act(acc, g, b, relu):
    """Training-mode BatchNorm (batch stats, biased var) folded into one FMA."""
    inv_m = 1.0 / float(acc.shape[0])
    s = jnp.sum(acc, axis=0, keepdims=True)
    ss = jnp.sum(acc * acc, axis=0, keepdims=True)
    mean = s * inv_m
    var = jnp.maximum(ss * inv_m - mean * mean, 0.0)
    scale = g * jax.lax.rsqrt(var + EPS)
    shift = b - mean * scale
    y = acc * scale + shift
    return jnp.maximum(y, 0.0) if relu else y
    # TODO(synk): running_mean/var tracking (eval-mode BN) is not implemented.


def _conv3x3_s1(x2d, w_ref, oy, ox, ho, wo, cout, pad_ref):
    """3x3 / stride-1 / pad-1 conv of a flattened NHWC activation, fully in VMEM.

    x2d     : (M, Cin) f32 value, M = N*ho*wo, rows in (n, oy, ox) row-major order.
    w_ref   : (9, Cin, Cout) bf16 ref, kernel-position major.
    oy, ox  : (M, 1) int32 spatial coordinates of each output row (precomputed).
    pad_ref : (M + 2*(wo+1), Cin) f32 VMEM scratch used to realize the spatially
              shifted views without strided/out-of-bounds access; rows that fall
              outside the written window are masked to zero (the conv padding).
    """
    M = x2d.shape[0]
    off0 = wo + 1

    active = [(i, j) for i in range(3) for j in range(3)
              if not ((ho == 1 and i != 1) or (wo == 1 and j != 1))]
    if any((i - 1) * wo + (j - 1) != 0 for (i, j) in active):
        pad_ref[pl.ds(off0, M), :] = x2d

    acc = jnp.zeros((M, cout), jnp.float32)
    for (i, j) in active:
        d = (i - 1) * wo + (j - 1)
        col = x2d if d == 0 else pad_ref[pl.ds(off0 + d, M), :]
        conds = []
        if i == 0:
            conds.append(oy >= 1)
        elif i == 2:
            conds.append(oy < ho - 1)
        if j == 0:
            conds.append(ox >= 1)
        elif j == 2:
            conds.append(ox < wo - 1)
        if conds:
            valid = conds[0]
            for c in conds[1:]:
                valid = jnp.logical_and(valid, c)
            col = jnp.where(valid, col, 0.0)
        acc = acc + jnp.dot(col.astype(jnp.bfloat16), w_ref[3 * i + j],
                            preferred_element_type=jnp.float32)
    return acc


# ---------------------------------------------------------------------------
# Kernels
# ---------------------------------------------------------------------------
def _stem_kernel(p_ref, w_ref, g_ref, b_ref, o_ref):
    # conv7x7/s2 as an im2col GEMM (bf16 operands, f32 accum) + BN + ReLU.
    acc = jnp.dot(p_ref[...], w_ref[...], preferred_element_type=jnp.float32)
    o_ref[...] = _bn_act(acc, g_ref[...], b_ref[...], relu=True).astype(o_ref.dtype)


def _make_maxpool_kernel(ho, wo):
    # MaxPool2d(3, stride=2, padding=1) over a phase-decomposed (-inf padded)
    # image: 9 contiguous slices of the 4 parity phases, pairwise max.
    def kernel(p00_ref, p01_ref, p10_ref, p11_ref, o_ref):
        phases = ((p00_ref, p01_ref), (p10_ref, p11_ref))
        out = None
        for i in range(3):
            for j in range(3):
                ref = phases[i % 2][j % 2]
                t = ref[:, i // 2:i // 2 + ho, j // 2:j // 2 + wo, :]
                out = t if out is None else jnp.maximum(out, t)
        o_ref[...] = out
    return kernel


def _make_block_s1_kernel(n, ho, wo, cin, cout):
    """Fused BasicBlock, stride 1, identity shortcut (cin == cout)."""
    assert cin == cout

    def kernel(x_ref, oy_ref, ox_ref,
               w1_ref, g1_ref, b1_ref,
               w2_ref, g2_ref, b2_ref,
               o_ref, pad1_ref, pad2_ref):
        x = x_ref[...]                       # (M, Cin) f32 -- also the residual
        oy = oy_ref[...]
        ox = ox_ref[...]
        acc1 = _conv3x3_s1(x, w1_ref, oy, ox, ho, wo, cout, pad1_ref)
        y1 = _bn_act(acc1, g1_ref[...], b1_ref[...], relu=True)
        acc2 = _conv3x3_s1(y1, w2_ref, oy, ox, ho, wo, cout, pad2_ref)
        y2 = _bn_act(acc2, g2_ref[...], b2_ref[...], relu=False)
        o_ref[...] = jnp.maximum(y2 + x, 0.0).astype(o_ref.dtype)

    return kernel


def _make_block_down_kernel(n, ho, wo, cin, cout):
    """Fused BasicBlock with downsample branch (stride 2 and/or channel change)."""

    def kernel(p1_ref, xd_ref, oy_ref, ox_ref,
               w1_ref, g1_ref, b1_ref,
               w2_ref, g2_ref, b2_ref,
               wd_ref, gd_ref, bd_ref,
               o_ref, pad_ref):
        oy = oy_ref[...]
        ox = ox_ref[...]
        # conv1 (3x3, stride s) as a GEMM on pre-built bf16 patches -> BN -> ReLU
        acc1 = jnp.dot(p1_ref[...], w1_ref[...], preferred_element_type=jnp.float32)
        y1 = _bn_act(acc1, g1_ref[...], b1_ref[...], relu=True)
        # conv2 (3x3, stride 1) with in-VMEM im2col -> BN
        acc2 = _conv3x3_s1(y1, w2_ref, oy, ox, ho, wo, cout, pad_ref)
        y2 = _bn_act(acc2, g2_ref[...], b2_ref[...], relu=False)
        # downsample: 1x1 stride-s conv -> BN
        accd = jnp.dot(xd_ref[...], wd_ref[...], preferred_element_type=jnp.float32)
        idn = _bn_act(accd, gd_ref[...], bd_ref[...], relu=False)
        o_ref[...] = jnp.maximum(y2 + idn, 0.0).astype(o_ref.dtype)

    return kernel


def _head_kernel(x_ref, w_ref, b_ref, o_ref):
    # AdaptiveAvgPool2d((1,1)) + flatten + Linear, fused.
    xm = jnp.mean(x_ref[...], axis=1)                       # (N, C) f32
    acc = jnp.dot(xm.astype(jnp.bfloat16), w_ref[...],
                  preferred_element_type=jnp.float32)
    o_ref[...] = (acc + b_ref[...]).astype(o_ref.dtype)


# ---------------------------------------------------------------------------
# Plain-JAX glue (padding, im2col for strided convs, phase split, reshapes)
# ---------------------------------------------------------------------------
def _im2col(x, kh, kw, stride, pad):
    """NHWC -> (N*Ho*Wo, kh*kw*C), kernel-position major / channel minor."""
    n, h, w, c = x.shape
    xp = jnp.pad(x, ((0, 0), (pad, pad), (pad, pad), (0, 0)))
    ho = (h + 2 * pad - kh) // stride + 1
    wo = (w + 2 * pad - kw) // stride + 1
    cols = []
    for i in range(kh):
        for j in range(kw):
            cols.append(xp[:, i:i + stride * ho:stride, j:j + stride * wo:stride, :])
    p = jnp.stack(cols, axis=3)                              # (N, Ho, Wo, kh*kw, C)
    return p.reshape(n * ho * wo, kh * kw * c), (n, ho, wo)


def _coords(n, ho, wo):
    oy = jnp.tile(jnp.repeat(jnp.arange(ho, dtype=jnp.int32), wo), n)
    ox = jnp.tile(jnp.arange(wo, dtype=jnp.int32), n * ho)
    return oy.reshape(-1, 1), ox.reshape(-1, 1)


def maxpool_3x3_s2_p1(x):
    n, h, w, c = x.shape
    assert h % 2 == 0 and w % 2 == 0
    ho, wo = h // 2, w // 2
    xp = jnp.pad(x, ((0, 0), (1, 1), (1, 1), (0, 0)), constant_values=-jnp.inf)
    phases = [xp[:, p::2, q::2, :] for p in (0, 1) for q in (0, 1)]
    return _run_full(_make_maxpool_kernel(ho, wo), phases, (n, ho, wo, c))


# ---------------------------------------------------------------------------
# Parameter init (deterministic; conv weights stored in bf16)
# ---------------------------------------------------------------------------
def _kaiming_conv(key, shape, fan_out):
    # kaiming_normal_(mode='fan_out', nonlinearity='relu'): std = sqrt(2 / fan_out)
    std = math.sqrt(2.0 / fan_out)
    return (std * jax.random.normal(key, shape, jnp.float32)).astype(jnp.bfloat16)


def init_basic_block(key, cin, cout, stride):
    # NOTE: weight layout is [kernel-position major, Cin minor] x Cout.  A
    # PyTorch (Cout, Cin, kh, kw) tensor maps via
    #   w.permute(2, 3, 1, 0).reshape(kh*kw*Cin, Cout)  (or reshape to (9, Cin, Cout)).
    k1, k2, k3 = jax.random.split(key, 3)
    p = {
        "stride": stride,
        "g1": jnp.ones((1, cout), jnp.float32),
        "b1": jnp.zeros((1, cout), jnp.float32),
        "w2": _kaiming_conv(k2, (9, cout, cout), cout * 9),
        "g2": jnp.ones((1, cout), jnp.float32),
        "b2": jnp.zeros((1, cout), jnp.float32),
    }
    if stride != 1 or cin != cout:
        # conv1 consumed as a pre-built im2col GEMM; 1x1 stride-s downsample conv.
        p["w1"] = _kaiming_conv(k1, (9 * cin, cout), cout * 9)
        p["wd"] = _kaiming_conv(k3, (cin, cout), cout * 1)
        p["gd"] = jnp.ones((1, cout), jnp.float32)
        p["bd"] = jnp.zeros((1, cout), jnp.float32)
    else:
        # conv1 im2col is built inside the fused kernel.
        p["w1"] = _kaiming_conv(k1, (9, cin, cout), cout * 9)
    return p


def init_resnet(key, blocks_num=(1, 1, 1, 1), num_classes=10):
    keys = jax.random.split(key, 2 + sum(blocks_num))
    ki = iter(keys)

    params = {}
    # stem conv7x7 s2 p3 (bias-free); K padded 147 -> 256 for aligned MXU pushes
    k_stem, k_pad = 7 * 7 * 3, 256
    w = math.sqrt(2.0 / (64 * 7 * 7)) * jax.random.normal(next(ki), (k_stem, 64), jnp.float32)
    params["conv1_w"] = jnp.pad(w, ((0, k_pad - k_stem), (0, 0))).astype(jnp.bfloat16)
    params["bn1_g"] = jnp.ones((1, 64), jnp.float32)
    params["bn1_b"] = jnp.zeros((1, 64), jnp.float32)

    in_ch = 64
    layers = []
    for idx, (ch, nblk) in enumerate(zip((64, 128, 256, 512), blocks_num)):
        first_stride = 1 if idx == 0 else 2
        blocks = []
        for bi in range(nblk):
            s = first_stride if bi == 0 else 1
            blocks.append(init_basic_block(next(ki), in_ch, ch, s))
            in_ch = ch
        layers.append(blocks)
    params["layers"] = layers

    # fc head; output lanes padded to a multiple of 128 (sliced in the wrapper)
    ncol = max(128, -(-num_classes // 128) * 128)
    fc = 0.02 * jax.random.normal(next(ki), (512, num_classes), jnp.float32)
    params["fc_w"] = jnp.pad(fc, ((0, 0), (0, ncol - num_classes))).astype(jnp.bfloat16)
    params["fc_b"] = jnp.zeros((1, ncol), jnp.float32)
    params["num_classes"] = num_classes
    return params


# ---------------------------------------------------------------------------
# Forward pass
# ---------------------------------------------------------------------------
def basic_block_forward(x_img, p):
    n, h, w, cin = x_img.shape
    stride = p["stride"]
    cout = p["g1"].shape[-1]
    ho = (h - 1) // stride + 1
    wo = (w - 1) // stride + 1
    M = n * ho * wo
    oy, ox = _coords(n, ho, wo)
    pad_rows = M + 2 * (wo + 1)

    if stride == 1 and "wd" not in p:
        x_flat = x_img.reshape(M, cin)
        out = _run_full(
            _make_block_s1_kernel(n, ho, wo, cin, cout),
            [x_flat, oy, ox, p["w1"], p["g1"], p["b1"], p["w2"], p["g2"], p["b2"]],
            (M, cout),
            scratch_shapes=[pltpu.VMEM((pad_rows, cin), jnp.float32),
                            pltpu.VMEM((pad_rows, cout), jnp.float32)])
    else:
        patches1, _ = _im2col(x_img, 3, 3, stride, 1)
        patches1 = patches1.astype(jnp.bfloat16)
        xd = x_img[:, ::stride, ::stride, :].reshape(M, cin).astype(jnp.bfloat16)
        out = _run_full(
            _make_block_down_kernel(n, ho, wo, cin, cout),
            [patches1, xd, oy, ox,
             p["w1"], p["g1"], p["b1"],
             p["w2"], p["g2"], p["b2"],
             p["wd"], p["gd"], p["bd"]],
            (M, cout),
            scratch_shapes=[pltpu.VMEM((pad_rows, cout), jnp.float32)])
    return out.reshape(n, ho, wo, cout)


def resnet_forward(x_nchw, params):
    x = jnp.transpose(x_nchw, (0, 2, 3, 1)).astype(jnp.float32)   # NCHW -> NHWC

    # stem: conv7x7 s2 p3 + BN + ReLU (one fused kernel), then maxpool
    patches, (n, ho, wo) = _im2col(x, 7, 7, 2, 3)
    kpad = params["conv1_w"].shape[0]
    patches = jnp.pad(patches, ((0, 0), (0, kpad - patches.shape[1])))
    patches = patches.astype(jnp.bfloat16)
    y = _run_full(_stem_kernel,
                  [patches, params["conv1_w"], params["bn1_g"], params["bn1_b"]],
                  (n * ho * wo, 64))
    x = y.reshape(n, ho, wo, 64)
    x = maxpool_3x3_s2_p1(x)

    # residual stages: one fused pallas_call per BasicBlock
    for blocks in params["layers"]:
        for bp in blocks:
            x = basic_block_forward(x, bp)

    # head: avgpool + flatten + fc (one fused kernel), slice off lane padding
    n, h, w, c = x.shape
    x3 = x.reshape(n, h * w, c)
    out = _run_full(_head_kernel, [x3, params["fc_w"], params["fc_b"]],
                    (n, params["fc_w"].shape[1]))
    return out[:, :params["num_classes"]]


# ---------------------------------------------------------------------------
if __name__ == "__main__":
    key = jax.random.PRNGKey(0)
    kx, kp = jax.random.split(key)

    # small ResNet: BasicBlock, blocks_num=[1,1,1,1], num_classes=10
    x = jax.random.normal(kx, (2, 3, 32, 32), jnp.float32)   # NCHW, like PyTorch
    params = init_resnet(kp, blocks_num=(1, 1, 1, 1), num_classes=10)

    out = resnet_forward(x, params)
    out = jax.block_until_ready(out)
    assert out.shape == (2, 10), out.shape
    assert bool(jnp.all(jnp.isfinite(out)))
    print("KERNEL_OK")
</pallas_src>

<mosaic_0001>
module attributes {stable_mosaic.version = 11 : i64} {
  func.func @_stem_kernel(%arg0: i32, %arg1: memref<512x256xbf16, #tpu.memory_space<vmem>>, %arg2: memref<256x64xbf16, #tpu.memory_space<vmem>>, %arg3: memref<1x64xf32, #tpu.memory_space<vmem>>, %arg4: memref<1x64xf32, #tpu.memory_space<vmem>>, %arg5: memref<512x64xf32, #tpu.memory_space<vmem>>) attributes {dimension_semantics = [#tpu.dimension_semantics<arbitrary>], iteration_bounds = array<i64: 1>, scalar_prefetch = 0 : i64, scratch_operands = 0 : i64, tpu.core_type = #tpu.core_type<tc>, window_params = [{pipeline_mode = #tpu.pipeline_mode<synchronous>, transform_indices = @transform_0, window_bounds = array<i64: 512, 256>}, {pipeline_mode = #tpu.pipeline_mode<synchronous>, transform_indices = @transform_1, window_bounds = array<i64: 256, 64>}, {pipeline_mode = #tpu.pipeline_mode<synchronous>, transform_indices = @transform_2, window_bounds = array<i64: 1, 64>}, {pipeline_mode = #tpu.pipeline_mode<synchronous>, transform_indices = @transform_3, window_bounds = array<i64: 1, 64>}, {pipeline_mode = #tpu.pipeline_mode<synchronous>, transform_indices = @transform_4, window_bounds = array<i64: 512, 64>}]} {
    %c0 = arith.constant 0 : index
    %c0_0 = arith.constant 0 : index
    %0 = vector.load %arg1[%c0, %c0_0] : memref<512x256xbf16, #tpu.memory_space<vmem>>, vector<512x256xbf16>
    %c0_1 = arith.constant 0 : index
    %c0_2 = arith.constant 0 : index
    %1 = vector.load %arg2[%c0_1, %c0_2] : memref<256x64xbf16, #tpu.memory_space<vmem>>, vector<256x64xbf16>
    %cst = arith.constant dense<0.000000e+00> : vector<512x64xf32>
    %2 = tpu.matmul %0, %1, %cst {dimension_numbers = #tpu.dot_dimension_numbers<[1], [0], [0], [1], [0, 0, 1, 1], [], []>} : vector<512x256xbf16>, vector<256x64xbf16>, vector<512x64xf32> -> vector<512x64xf32>
    %c0_3 = arith.constant 0 : index
    %c0_4 = arith.constant 0 : index
    %3 = vector.load %arg3[%c0_3, %c0_4] : memref<1x64xf32, #tpu.memory_space<vmem>>, vector<1x64xf32>
    %c0_5 = arith.constant 0 : index
    %c0_6 = arith.constant 0 : index
    %4 = vector.load %arg4[%c0_5, %c0_6] : memref<1x64xf32, #tpu.memory_space<vmem>>, vector<1x64xf32>
    %cst_7 = arith.constant dense<0.000000e+00> : vector<64xf32>
    %5 = vector.multi_reduction <add>, %2, %cst_7 [0] : vector<512x64xf32> to vector<64xf32>
    %6 = vector.shape_cast %5 : vector<64xf32> to vector<1x64xf32>
    %7 = arith.mulf %2, %2 : vector<512x64xf32>
    %cst_8 = arith.constant dense<0.000000e+00> : vector<64xf32>
    %8 = vector.multi_reduction <add>, %7, %cst_8 [0] : vector<512x64xf32> to vector<64xf32>
    %9 = vector.shape_cast %8 : vector<64xf32> to vector<1x64xf32>
    %cst_9 = arith.constant 0.001953125 : f32
    %10 = vector.broadcast %cst_9 : f32 to vector<1x64xf32>
    %11 = arith.mulf %6, %10 : vector<1x64xf32>
    %cst_10 = arith.constant 0.001953125 : f32
    %12 = vector.broadcast %cst_10 : f32 to vector<1x64xf32>
    %13 = arith.mulf %9, %12 : vector<1x64xf32>
    %14 = arith.mulf %11, %11 : vector<1x64xf32>
    %15 = arith.subf %13, %14 : vector<1x64xf32>
    %cst_11 = arith.constant 0.000000e+00 : f32
    %16 = vector.broadcast %cst_11 : f32 to vector<1x64xf32>
    %17 = arith.maximumf %15, %16 : vector<1x64xf32>
    %cst_12 = arith.constant 9.99999974E-6 : f32
    %18 = vector.broadcast %cst_12 : f32 to vector<1x64xf32>
    %19 = arith.addf %17, %18 : vector<1x64xf32>
    %20 = math.rsqrt %19 : vector<1x64xf32>
    %21 = arith.mulf %3, %20 : vector<1x64xf32>
    %22 = arith.mulf %11, %21 : vector<1x64xf32>
    %23 = arith.subf %4, %22 : vector<1x64xf32>
    %24 = vector.broadcast %21 : vector<1x64xf32> to vector<512x64xf32>
    %25 = arith.mulf %2, %24 : vector<512x64xf32>
    %26 = vector.broadcast %23 : vector<1x64xf32> to vector<512x64xf32>
    %27 = arith.addf %25, %26 : vector<512x64xf32>
    %cst_13 = arith.constant 0.000000e+00 : f32
    %28 = vector.broadcast %cst_13 : f32 to vector<512x64xf32>
    %29 = arith.maximumf %27, %28 : vector<512x64xf32>
    %c0_14 = arith.constant 0 : index
    %c0_15 = arith.constant 0 : index
    %30 = vector.load %arg5[%c0_14, %c0_15] : memref<512x64xf32, #tpu.memory_space<vmem>>, vector<512x64xf32>
    tpu.vector_store %arg5[%c0_14, %c0_15], %29 {strides = array<i32>} : memref<512x64xf32, #tpu.memory_space<vmem>>, vector<512x64xf32>,
    return
  }
  func.func @transform_0(%arg0: i32) -> (i32, i32) {
    %c0_i32 = arith.constant 0 : i32
    %c0_i32_0 = arith.constant 0 : i32
    %c0_i32_1 = arith.constant 0 : i32
    return %c0_i32, %c0_i32_0 : i32, i32
  }
  func.func @transform_1(%arg0: i32) -> (i32, i32) {
    %c0_i32 = arith.constant 0 : i32
    %c0_i32_0 = arith.constant 0 : i32
    %c0_i32_1 = arith.constant 0 : i32
    return %c0_i32, %c0_i32_0 : i32, i32
  }
  func.func @transform_2(%arg0: i32) -> (i32, i32) {
    %c0_i32 = arith.constant 0 : i32
    %c0_i32_0 = arith.constant 0 : i32
    %c0_i32_1 = arith.constant 0 : i32
    return %c0_i32, %c0_i32_0 : i32, i32
  }
  func.func @transform_3(%arg0: i32) -> (i32, i32) {
    %c0_i32 = arith.constant 0 : i32
    %c0_i32_0 = arith.constant 0 : i32
    %c0_i32_1 = arith.constant 0 : i32
    return %c0_i32, %c0_i32_0 : i32, i32
  }
  func.func @transform_4(%arg0: i32) -> (i32, i32) {
    %c0_i32 = arith.constant 0 : i32
    %c0_i32_0 = arith.constant 0 : i32
    %c0_i32_1 = arith.constant 0 : i32
    return %c0_i32, %c0_i32_0 : i32, i32
  }
}

</mosaic_0001>

<bundles_post_ra>
// kernel: tpu_custom_call.1
= control target key start
LH: loop header
LB: loop body
LE: loop exit
PB: predicated region body
PF: predicated region fallthrough
CT: control target
= control target key end

     0   :  { %9 = vsyncpa [#allocation3], 0  ;;  %s1703_s15 = smov [#allocation2]   ;;  %s3130_s0 = inlined_call_operand.hbm [shape: bf16[512,256], index: 0, kind: input, shape index: {}]   ;;  %s3131_s1 = inlined_call_operand.vmem [shape: bf16[256,64], index: 1, kind: input, shape index: {}]   ;;  %s3132_s2 = inlined_call_operand.vmem [shape: f32[1,64], index: 2, kind: input, shape index: {}]   ;;  %s3133_s3 = inlined_call_operand.vmem [shape: f32[1,64], index: 3, kind: input, shape index: {}]   ;;  %s3134_s4 = inlined_call_operand.vmem [shape: f32[512,64], index: 4, kind: output, shape index: {}]  }
   0x1   :  { %s15_s16 = sshll.u32 %s1703_s15, 4  ;;  %s1679_s19 = scalar_lea.hbm %s3130_s0, 8192  ;;  %s16_s16 = int_to_ptr.vmem [resolvable:$true] %s15_s16 }
   0x2   :  { %p1680_p0 = scmp.ne.s32.totalorder %s3130_s0, %s1679_s19  ;;  %p1683_p1 = scmp.lt.u32.totalorder %s1679_s19, %s3130_s0 }
   0x4   :  { %p1685_p2 = pnand %p1683_p1, %p1680_p0 }
   0x6   :  { %1688 = shalt.err (!%p1685_p2)
}
   0x7   :  { %s1689_s24 = scalar_lea.vmem %s16_s16, 8192  ;;  %p1694_p4 = scmp.lt.s32.totalorder %s16_s16, %s16_s16 }
   0x8   :  { %p1690_p3 = scmp.ne.s32.totalorder %s16_s16, %s1689_s24  ;;  %p1695_p5 = scmp.lt.s32.totalorder %s1689_s24, %s1689_s24 }
   0xa   :  { %p1696_p6 = por %p1695_p5, %p1694_p4 }
   0xc   :  { %p1697_p7 = pnand %p1696_p6, %p1690_p3 }
   0xe   :  { %1700 = shalt.err (!%p1697_p7)
}
   0xf   :  { %s1704_s25 = smov 128   ;;  %s1705_s26 = smov 8  }
  0x10   :  { %21 = dma.hbm_to_vmem [thread:$0]  %s3130_s0, 8192, %s16_s16, [#allocation3], %s1704_s25, %s1704_s25, %s1705_s26  }
  0x11   :  { %1701 = dma.done.wait [#allocation3], 8192  }
  0x12   :  { %1702 = vsyncadd [#allocation3], 4294959104  ;;  %v1706_v0 = vmov 0   ;;  %v1565_v1 = vld [vmem:[%s3131_s1] sm:$0xff]   ;;  %v1566_v2 = vld [vmem:[%s3131_s1 + $0x8] sm:$0xff]   ;;  %vm835_vm0 = vcmask 523264  }
  0x13   :  { %544 = vmatprep.subr.bf16.mxu0 %v1706_v0  ;;  %1529 = vmatprep.subr.bf16.mxu1 %v1706_v0  ;;  %v1567_v3 = vld [vmem:[%s3131_s1 + $0x10] sm:$0xff]   ;;  %v1568_v4 = vld [vmem:[%s3131_s1 + $0x18] sm:$0xff]   ;;  %v1569_v5 = vld [vmem:[%s3131_s1 + $0x20] sm:$0xff]  }
  0x14   :  { %545 = vmatpush1.bf16.msra.mxu0 %v1565_v1  ;;  %1545 = vmatpush1.bf16.msra.mxu1 %v1565_v1  ;;  %v1583_v6 = vld [vmem:[#allocation2 + $0x4] ss:$8 sps:$4 sm:$0xff]   ;;  %v1571_v8 = vld [vmem:[%s3131_s1 + $0x30] sm:$0xff]   ;;  %v1572_v9 = vld [vmem:[%s3131_s1 + $0x38] sm:$0xff]  }
  0x15   :  { %546 = vmatprep.subr.bf16.mxu0 %v1706_v0  ;;  %1530 = vmatprep.subr.bf16.mxu1 %v1706_v0  ;;  %v1570_v7 = vld [vmem:[%s3131_s1 + $0x28] sm:$0xff]   ;;  %v1573_v11 = vld [vmem:[%s3131_s1 + $0x40] sm:$0xff]   ;;  %v1575_v13 = vld [vmem:[%s3131_s1 + $0x50] sm:$0xff]  }
  0x16   :  { %576 = vmatprep.mubr.bf16.mxu0 %v1583_v6  ;;  %v1607_v10 = vld [vmem:[#allocation2 + $0x104] ss:$8 sps:$4 sm:$0xff]   ;;  %v1576_v14 = vld [vmem:[%s3131_s1 + $0x58] sm:$0xff]   ;;  %v1579_v17 = vld [vmem:[%s3131_s1 + $0x70] sm:$0xff]  }
  0x17   :  { %704 = vmatprep.mubr.bf16.mxu1 %v1607_v10  ;;  %v1574_v12 = vld [vmem:[%s3131_s1 + $0x48] sm:$0xff]   ;;  %v1577_v15 = vld [vmem:[%s3131_s1 + $0x60] sm:$0xff]   ;;  %v1580_v18 = vld [vmem:[%s3131_s1 + $0x78] sm:$0xff]  }
  0x18   :  { %547 = vmatpush1.bf16.msra.mxu0 %v1566_v2  ;;  %1546 = vmatpush1.bf16.msra.mxu1 %v1566_v2  ;;  %v1578_v16 = vld [vmem:[%s3131_s1 + $0x68] sm:$0xff]   ;;  %v1584_v21 = vld [vmem:[#allocation2 + $0x14] ss:$8 sps:$4 sm:$0xff]   ;;  %v1586_v23 = vld [vmem:[#allocation2 + $0x10] ss:$8 sps:$4 sm:$0xff]  }
  0x19   :  { %548 = vmatprep.subr.bf16.mxu0 %v1706_v0  ;;  %1531 = vmatprep.subr.bf16.mxu1 %v1706_v0  ;;  %v1581_v19 = vld [vmem:[#allocation2] ss:$8 sps:$4 sm:$0xff]   ;;  %v1611_v22 = vld [vmem:[#allocation2 + $0x114] ss:$8 sps:$4 sm:$0xff]   ;;  %v1613_v24 = vld [vmem:[#allocation2 + $0x110] ss:$8 sps:$4 sm:$0xff]  }
  0x1a   :  { %v1605_v20 = vld [vmem:[#allocation2 + $0x100] ss:$8 sps:$4 sm:$0xff]   ;;  %v1587_v25 = vld [vmem:[#allocation2 + $0x24] ss:$8 sps:$4 sm:$0xff]   ;;  %v1590_v29 = vld [vmem:[#allocation2 + $0x34] ss:$8 sps:$4 sm:$0xff]  }
  0x1b   :  { %v1617_v26 = vld [vmem:[#allocation2 + $0x124] ss:$8 sps:$4 sm:$0xff]   ;;  %v1589_v27 = vld [vmem:[#allocation2 + $0x20] ss:$8 sps:$4 sm:$0xff]   ;;  %v1623_v30 = vld [vmem:[#allocation2 + $0x134] ss:$8 sps:$4 sm:$0xff]  }
  0x1c   :  { %549 = vmatpush1.bf16.msra.mxu0 %v1567_v3  ;;  %1547 = vmatpush1.bf16.msra.mxu1 %v1567_v3  ;;  %v1619_v28 = vld [vmem:[#allocation2 + $0x120] ss:$8 sps:$4 sm:$0xff]   ;;  %v1592_v31 = vld [vmem:[#allocation2 + $0x30] ss:$8 sps:$4 sm:$0xff]   ;;  %v1593_v33 = vld [vmem:[#allocation2 + $0x44] ss:$8 sps:$4 sm:$0xff]  }
  0x1d   :  { %550 = vmatprep.subr.bf16.mxu0 %v1706_v0  ;;  %1532 = vmatprep.subr.bf16.mxu1 %v1706_v0  ;;  %v1625_v32 = vld [vmem:[#allocation2 + $0x130] ss:$8 sps:$4 sm:$0xff]   ;;  %v1629_v34 = vld [vmem:[#allocation2 + $0x144] ss:$8 sps:$4 sm:$0xff]   ;;  %v1595_v35 = vld [vmem:[#allocation2 + $0x40] ss:$8 sps:$4 sm:$0xff]  }
  0x1e   :  { %v1631_v36 = vld [vmem:[#allocation2 + $0x140] ss:$8 sps:$4 sm:$0xff]   ;;  %v1596_v37 = vld [vmem:[#allocation2 + $0x54] ss:$8 sps:$4 sm:$0xff]   ;;  %v1598_v39 = vld [vmem:[#allocation2 + $0x50] ss:$8 sps:$4 sm:$0xff]  }
  0x1f   :  { %v1635_v38 = vld [vmem:[#allocation2 + $0x154] ss:$8 sps:$4 sm:$0xff]   ;;  %v1637_v40 = vld [vmem:[#allocation2 + $0x150] ss:$8 sps:$4 sm:$0xff]   ;;  %v1599_v41 = vld [vmem:[#allocation2 + $0x64] ss:$8 sps:$4 sm:$0xff]  }
  0x20   :  { %551 = vmatpush1.bf16.msra.mxu0 %v1568_v4  ;;  %1548 = vmatpush1.bf16.msra.mxu1 %v1568_v4  ;;  %v1641_v42 = vld [vmem:[#allocation2 + $0x164] ss:$8 sps:$4 sm:$0xff]   ;;  %v1601_v43 = vld [vmem:[#allocation2 + $0x60] ss:$8 sps:$4 sm:$0xff]   ;;  %v1602_v45 = vld [vmem:[#allocation2 + $0x74] ss:$8 sps:$4 sm:$0xff]  }
  0x21   :  { %552 = vmatprep.subr.bf16.mxu0 %v1706_v0  ;;  %1533 = vmatprep.subr.bf16.mxu1 %v1706_v0  ;;  %v1643_v44 = vld [vmem:[#allocation2 + $0x160] ss:$8 sps:$4 sm:$0xff]   ;;  %v1647_v46 = vld [vmem:[#allocation2 + $0x174] ss:$8 sps:$4 sm:$0xff]   ;;  %v1604_v47 = vld [vmem:[#allocation2 + $0x70] ss:$8 sps:$4 sm:$0xff]  }
  0x22   :  { %v1649_v48 = vld [vmem:[#allocation2 + $0x170] ss:$8 sps:$4 sm:$0xff]   ;;  %v1608_v49 = vld [vmem:[#allocation2 + $0x84] ss:$8 sps:$4 sm:$0xff]   ;;  %v1610_v51 = vld [vmem:[#allocation2 + $0x80] ss:$8 sps:$4 sm:$0xff]  }
  0x23   :  { %v1653_v50 = vld [vmem:[#allocation2 + $0x184] ss:$8 sps:$4 sm:$0xff]   ;;  %v1655_v52 = vld [vmem:[#allocation2 + $0x180] ss:$8 sps:$4 sm:$0xff]   ;;  %v1614_v53 = vld [vmem:[#allocation2 + $0x94] ss:$8 sps:$4 sm:$0xff]  }
  0x24   :  { %553 = vmatpush1.bf16.msra.mxu0 %v1569_v5  ;;  %1549 = vmatpush1.bf16.msra.mxu1 %v1569_v5  ;;  %v1656_v54 = vld [vmem:[#allocation2 + $0x194] ss:$8 sps:$4 sm:$0xff]   ;;  %v1616_v55 = vld [vmem:[#allocation2 + $0x90] ss:$8 sps:$4 sm:$0xff]   ;;  %v1620_v57 = vld [vmem:[#allocation2 + $0xa4] ss:$8 sps:$4 sm:$0xff]  }
  0x25   :  { %554 = vmatprep.subr.bf16.mxu0 %v1706_v0  ;;  %1534 = vmatprep.subr.bf16.mxu1 %v1706_v0  ;;  %v1658_v56 = vld [vmem:[#allocation2 + $0x190] ss:$8 sps:$4 sm:$0xff]   ;;  %v1659_v58 = vld [vmem:[#allocation2 + $0x1a4] ss:$8 sps:$4 sm:$0xff]   ;;  %v1622_v59 = vld [vmem:[#allocation2 + $0xa0] ss:$8 sps:$4 sm:$0xff]  }
  0x26   :  { %v1661_v60 = vld [vmem:[#allocation2 + $0x1a0] ss:$8 sps:$4 sm:$0xff]   ;;  %v1626_v61 = vld [vmem:[#allocation2 + $0xb4] ss:$8 sps:$4 sm:$0xff]   ;;  %v1628_v63 = vld [vmem:[#allocation2 + $0xb0] ss:$8 sps:$4 sm:$0xff]  }
  0x27   :  { %v1662_v62 = vld [vmem:[#allocation2 + $0x1b4] ss:$8 sps:$4 sm:$0xff]   ;;  %v1632_v1 = vld [vmem:[#allocation2 + $0xc4] ss:$8 sps:$4 sm:$0xff]   ;;  %v1634_v3 = vld [vmem:[#allocation2 + $0xc0] ss:$8 sps:$4 sm:$0xff]  }
  0x28   :  { %555 = vmatpush1.bf16.msra.mxu0 %v1570_v7  ;;  %1550 = vmatpush1.bf16.msra.mxu1 %v1570_v7  ;;  %v1665_v2 = vld [vmem:[#allocation2 + $0x1c4] ss:$8 sps:$4 sm:$0xff]   ;;  %v1667_v4 = vld [vmem:[#allocation2 + $0x1c0] ss:$8 sps:$4 sm:$0xff]   ;;  %v1638_v5 = vld [vmem:[#allocation2 + $0xd4] ss:$8 sps:$4 sm:$0xff]  }
  0x29   :  { %556 = vmatprep.subr.bf16.mxu0 %v1706_v0  ;;  %1535 = vmatprep.subr.bf16.mxu1 %v1706_v0  ;;  %v1668_v6 = vld [vmem:[#allocation2 + $0x1d4] ss:$8 sps:$4 sm:$0xff]   ;;  %v1640_v7 = vld [vmem:[#allocation2 + $0xd0] ss:$8 sps:$4 sm:$0xff]   ;;  %v1671_v10 = vld [vmem:[#allocation2 + $0x1e4] ss:$8 sps:$4 sm:$0xff]  }
  0x2c   :  { %557 = vmatpush1.bf16.msra.mxu0 %v1571_v8  ;;  %1551 = vmatpush1.bf16.msra.mxu1 %v1571_v8  ;;  %v1670_v8 = vld [vmem:[#allocation2 + $0x1d0] ss:$8 sps:$4 sm:$0xff]  }
  0x2d   :  { %558 = vmatprep.subr.bf16.mxu0 %v1706_v0  ;;  %1536 = vmatprep.subr.bf16.mxu1 %v1706_v0 }
  0x30   :  { %559 = vmatpush1.bf16.msra.mxu0 %v1572_v9  ;;  %1552 = vmatpush1.bf16.msra.mxu1 %v1572_v9  ;;  %v1644_v9 = vld [vmem:[#allocation2 + $0xe4] ss:$8 sps:$4 sm:$0xff]  }
  0x31   :  { %560 = vmatprep.subr.bf16.mxu0 %v1706_v0  ;;  %1537 = vmatprep.subr.bf16.mxu1 %v1706_v0 }
  0x34   :  { %561 = vmatpush1.bf16.msra.mxu0 %v1573_v11  ;;  %1553 = vmatpush1.bf16.msra.mxu1 %v1573_v11  ;;  %v1646_v11 = vld [vmem:[#allocation2 + $0xe0] ss:$8 sps:$4 sm:$0xff]  }
  0x35   :  { %562 = vmatprep.subr.bf16.mxu0 %v1706_v0  ;;  %1538 = vmatprep.subr.bf16.mxu1 %v1706_v0 }
  0x38   :  { %563 = vmatpush1.bf16.msra.mxu0 %v1574_v12  ;;  %1554 = vmatpush1.bf16.msra.mxu1 %v1574_v12  ;;  %v1673_v12 = vld [vmem:[#allocation2 + $0x1e0] ss:$8 sps:$4 sm:$0xff]  }
  0x39   :  { %564 = vmatprep.subr.bf16.mxu0 %v1706_v0  ;;  %1539 = vmatprep.subr.bf16.mxu1 %v1706_v0 }
  0x3c   :  { %565 = vmatpush1.bf16.msra.mxu0 %v1575_v13  ;;  %1555 = vmatpush1.bf16.msra.mxu1 %v1575_v13  ;;  %v1650_v13 = vld [vmem:[#allocation2 + $0xf4] ss:$8 sps:$4 sm:$0xff]  }
  0x3d   :  { %566 = vmatprep.subr.bf16.mxu0 %v1706_v0  ;;  %1540 = vmatprep.subr.bf16.mxu1 %v1706_v0 }
  0x40   :  { %567 = vmatpush1.bf16.msra.mxu0 %v1576_v14  ;;  %1556 = vmatpush1.bf16.msra.mxu1 %v1576_v14  ;;  %v1674_v14 = vld [vmem:[#allocation2 + $0x1f4] ss:$8 sps:$4 sm:$0xff]  }
  0x41   :  { %568 = vmatprep.subr.bf16.mxu0 %v1706_v0  ;;  %1541 = vmatprep.subr.bf16.mxu1 %v1706_v0 }
  0x44   :  { %569 = vmatpush1.bf16.msra.mxu0 %v1577_v15  ;;  %1557 = vmatpush1.bf16.msra.mxu1 %v1577_v15  ;;  %v1652_v15 = vld [vmem:[#allocation2 + $0xf0] ss:$8 sps:$4 sm:$0xff]  }
  0x45   :  { %570 = vmatprep.subr.bf16.mxu0 %v1706_v0  ;;  %1542 = vmatprep.subr.bf16.mxu1 %v1706_v0 }
  0x48   :  { %571 = vmatpush1.bf16.msra.mxu0 %v1578_v16  ;;  %1558 = vmatpush1.bf16.msra.mxu1 %v1578_v16  ;;  %v1676_v16 = vld [vmem:[#allocation2 + $0x1f0] ss:$8 sps:$4 sm:$0xff]  }
  0x49   :  { %572 = vmatprep.subr.bf16.mxu0 %v1706_v0  ;;  %1543 = vmatprep.subr.bf16.mxu1 %v1706_v0 }
  0x4c   :  { %573 = vmatpush1.bf16.msra.mxu0 %v1579_v17  ;;  %1559 = vmatpush1.bf16.msra.mxu1 %v1579_v17 }
  0x4d   :  { %574 = vmatprep.subr.bf16.mxu0 %v1706_v0  ;;  %1544 = vmatprep.subr.bf16.mxu1 %v1706_v0  ;;  %v1664_v0 = vld [vmem:[#allocation2 + $0x1b0] ss:$8 sps:$4 sm:$0xff]  }
  0x50   :  { %575 = vmatpush1.bf16.msra.mxu0 %v1580_v18  ;;  %1560 = vmatpush1.bf16.msra.mxu1 %v1580_v18 }
  0x53   :  { %577 = vmatmul.mubr.bf16.vlgmr.msra.gmra.mrb[0].mxu0 %v1581_v19  ;;  %705 = vmatmul.mubr.bf16.vlgmr.msra.gmra.mrb[0].mxu1 %v1605_v20 }
  0x54   :  { %584 = vmatprep.mubr.bf16.mxu0 %v1584_v21  ;;  %712 = vmatprep.mubr.bf16.mxu1 %v1611_v22 }
  0x5b   :  { %585 = vmatmul.mubr.bf16.gmra.mrb[4].mxu0 %v1586_v23  ;;  %713 = vmatmul.mubr.bf16.gmra.mrb[4].mxu1 %v1613_v24 }
  0x5c   :  { %592 = vmatprep.mubr.bf16.mxu0 %v1587_v25  ;;  %720 = vmatprep.mubr.bf16.mxu1 %v1617_v26 }
  0x63   :  { %593 = vmatmul.mubr.bf16.gmra.mrb[8].mxu0 %v1589_v27  ;;  %721 = vmatmul.mubr.bf16.gmra.mrb[8].mxu1 %v1619_v28 }
  0x64   :  { %600 = vmatprep.mubr.bf16.mxu0 %v1590_v29  ;;  %728 = vmatprep.mubr.bf16.mxu1 %v1623_v30 }
  0x6b   :  { %601 = vmatmul.mubr.bf16.gmra.mrb[12].mxu0 %v1592_v31  ;;  %729 = vmatmul.mubr.bf16.gmra.mrb[12].mxu1 %v1625_v32 }
  0x6c   :  { %608 = vmatprep.mubr.bf16.mxu0 %v1593_v33  ;;  %736 = vmatprep.mubr.bf16.mxu1 %v1629_v34 }
  0x73   :  { %609 = vmatmul.mubr.bf16.gmra.mrb[16].mxu0 %v1595_v35  ;;  %737 = vmatmul.mubr.bf16.gmra.mrb[16].mxu1 %v1631_v36 }
  0x74   :  { %616 = vmatprep.mubr.bf16.mxu0 %v1596_v37  ;;  %744 = vmatprep.mubr.bf16.mxu1 %v1635_v38 }
  0x7b   :  { %617 = vmatmul.mubr.bf16.gmra.mrb[20].mxu0 %v1598_v39  ;;  %745 = vmatmul.mubr.bf16.gmra.mrb[20].mxu1 %v1637_v40 }
  0x7c   :  { %624 = vmatprep.mubr.bf16.mxu0 %v1599_v41  ;;  %752 = vmatprep.mubr.bf16.mxu1 %v1641_v42 }
  0x83   :  { %625 = vmatmul.mubr.bf16.gmra.mrb[24].mxu0 %v1601_v43  ;;  %753 = vmatmul.mubr.bf16.gmra.mrb[24].mxu1 %v1643_v44 }
  0x84   :  { %632 = vmatprep.mubr.bf16.mxu0 %v1602_v45  ;;  %760 = vmatprep.mubr.bf16.mxu1 %v1647_v46 }
  0x8b   :  { %633 = vmatmul.mubr.bf16.gmra.mrb[28].mxu0 %v1604_v47  ;;  %761 = vmatmul.mubr.bf16.gmra.mrb[28].mxu1 %v1649_v48 }
  0x8c   :  { %640 = vmatprep.mubr.bf16.mxu0 %v1608_v49  ;;  %768 = vmatprep.mubr.bf16.mxu1 %v1653_v50 }
  0x93   :  { %641 = vmatmul.mubr.bf16.gmra.mrb[32].mxu0 %v1610_v51  ;;  %769 = vmatmul.mubr.bf16.gmra.mrb[32].mxu1 %v1655_v52 }
  0x94   :  { %648 = vmatprep.mubr.bf16.mxu0 %v1614_v53  ;;  %776 = vmatprep.mubr.bf16.mxu1 %v1656_v54 }
  0x9b   :  { %649 = vmatmul.mubr.bf16.gmra.mrb[36].mxu0 %v1616_v55  ;;  %777 = vmatmul.mubr.bf16.gmra.mrb[36].mxu1 %v1658_v56 }
  0x9c   :  { %656 = vmatprep.mubr.bf16.mxu0 %v1620_v57  ;;  %784 = vmatprep.mubr.bf16.mxu1 %v1659_v58 }
  0xa3   :  { %657 = vmatmul.mubr.bf16.gmra.mrb[40].mxu0 %v1622_v59  ;;  %785 = vmatmul.mubr.bf16.gmra.mrb[40].mxu1 %v1661_v60 }
  0xa4   :  { %664 = vmatprep.mubr.bf16.mxu0 %v1626_v61  ;;  %792 = vmatprep.mubr.bf16.mxu1 %v1662_v62 }
  0xab   :  { %665 = vmatmul.mubr.bf16.gmra.mrb[44].mxu0 %v1628_v63  ;;  %793 = vmatmul.mubr.bf16.gmra.mrb[44].mxu1 %v1664_v0 }
  0xac   :  { %672 = vmatprep.mubr.bf16.mxu0 %v1632_v1  ;;  %800 = vmatprep.mubr.bf16.mxu1 %v1665_v2 }
  0xb3   :  { %673 = vmatmul.mubr.bf16.gmra.mrb[48].mxu0 %v1634_v3  ;;  %801 = vmatmul.mubr.bf16.gmra.mrb[48].mxu1 %v1667_v4 }
  0xb4   :  { %680 = vmatprep.mubr.bf16.mxu0 %v1638_v5  ;;  %808 = vmatprep.mubr.bf16.mxu1 %v1668_v6 }
  0xbb   :  { %681 = vmatmul.mubr.bf16.gmra.mrb[52].mxu0 %v1640_v7  ;;  %809 = vmatmul.mubr.bf16.gmra.mrb[52].mxu1 %v1670_v8 }
  0xbc   :  { %688 = vmatprep.mubr.bf16.mxu0 %v1644_v9  ;;  %816 = vmatprep.mubr.bf16.mxu1 %v1671_v10 }
  0xc3   :  { %689 = vmatmul.mubr.bf16.gmra.mrb[56].mxu0 %v1646_v11  ;;  %817 = vmatmul.mubr.bf16.gmra.mrb[56].mxu1 %v1673_v12 }
  0xc4   :  { %696 = vmatprep.mubr.bf16.mxu0 %v1650_v13  ;;  %824 = vmatprep.mubr.bf16.mxu1 %v1674_v14 }
  0xcb   :  { %697 = vmatmul.mubr.bf16.gmra.mrb[60].mxu0 %v1652_v15  ;;  %825 = vmatmul.mubr.bf16.gmra.mrb[60].mxu1 %v1676_v16 }
 0x126   :  { %v1824_v17 = vpop.f32.mrb[0].mxu0  ;;  %v1826_v18 = vpop.f32.mrb[0].mxu1 }
 0x127   :  { %v969_v19 = vmul.f32 %v1824_v17, %v1824_v17  ;;  %v580_v20 = vpop.f32.mrb[1].mxu0  ;;  %v708_v21 = vpop.f32.mrb[1].mxu1  ;;  %v836_v24 = vsel %vm835_vm0, %v1824_v17, 0.0 }
 0x128   :  { %v1830_v22 = vpop.f32.mrb[2].mxu0  ;;  %v1832_v23 = vpop.f32.mrb[2].mxu1 }
 0x129   :  { %v837_v25 = vsel %vm835_vm0, %v1830_v22, 0.0  ;;  %v970_v26 = vmul.f32 %v1830_v22, %v1830_v22  ;;  %v583_v27 = vpop.f32.mrb[3].mxu0  ;;  %v711_v28 = vpop.f32.mrb[3].mxu1  ;;  %v1033_v30 = vsel %vm835_vm0, %v969_v19, 0.0 }
 0x12a   :  { %v838_v29 = vadd.f32 %v837_v25, %v836_v24 }
 0x12b   :  { %v1034_v31 = vsel %vm835_vm0, %v970_v26, 0.0 }
 0x12c   :  { %v1035_v32 = vadd.f32 %v1034_v31, %v1033_v30 }
 0x12e   :  { %v1842_v33 = vpop.f32.mrb[4].mxu0  ;;  %v1844_v34 = vpop.f32.mrb[4].mxu1 }
 0x12f   :  { %v839_v35 = vsel %vm835_vm0, %v1842_v33, 0.0  ;;  %v971_v36 = vmul.f32 %v1842_v33, %v1842_v33  ;;  %v588_v37 = vpop.f32.mrb[5].mxu0  ;;  %v716_v38 = vpop.f32.mrb[5].mxu1 }
 0x130   :  { %v840_v39 = vadd.f32 %v839_v35, %v838_v29  ;;  %v1850_v40 = vpop.f32.mrb[6].mxu0  ;;  %v1852_v41 = vpop.f32.mrb[6].mxu1 }
 0x131   :  { %v1036_v42 = vsel %vm835_vm0, %v971_v36, 0.0  ;;  %v841_v43 = vsel %vm835_vm0, %v1850_v40, 0.0  ;;  %v972_v44 = vmul.f32 %v1850_v40, %v1850_v40  ;;  %v591_v45 = vpop.f32.mrb[7].mxu0  ;;  %v719_v46 = vpop.f32.mrb[7].mxu1 }
 0x132   :  { %v1037_v47 = vadd.f32 %v1036_v42, %v1035_v32  ;;  %v842_v48 = vadd.f32 %v841_v43, %v840_v39 }
 0x133   :  { %v1038_v49 = vsel %vm835_vm0, %v972_v44, 0.0 }
 0x134   :  { %v1039_v50 = vadd.f32 %v1038_v49, %v1037_v47 }
 0x136   :  { %v1860_v51 = vpop.f32.mrb[8].mxu0  ;;  %v1862_v52 = vpop.f32.mrb[8].mxu1 }
 0x137   :  { %v843_v53 = vsel %vm835_vm0, %v1860_v51, 0.0  ;;  %v973_v54 = vmul.f32 %v1860_v51, %v1860_v51  ;;  %v596_v55 = vpop.f32.mrb[9].mxu0  ;;  %v724_v56 = vpop.f32.mrb[9].mxu1 }
 0x138   :  { %v844_v57 = vadd.f32 %v843_v53, %v842_v48  ;;  %v1868_v58 = vpop.f32.mrb[10].mxu0  ;;  %v1870_v59 = vpop.f32.mrb[10].mxu1 }
 0x139   :  { %v1040_v60 = vsel %vm835_vm0, %v973_v54, 0.0  ;;  %v845_v61 = vsel %vm835_vm0, %v1868_v58, 0.0  ;;  %v974_v62 = vmul.f32 %v1868_v58, %v1868_v58  ;;  %v599_v63 = vpop.f32.mrb[11].mxu0  ;;  %v727_v0 = vpop.f32.mrb[11].mxu1 }
 0x13a   :  { %v1041_v1 = vadd.f32 %v1040_v60, %v1039_v50  ;;  %v846_v2 = vadd.f32 %v845_v61, %v844_v57 }
 0x13b   :  { %v1042_v3 = vsel %vm835_vm0, %v974_v62, 0.0 }
 0x13c   :  { %v1043_v4 = vadd.f32 %v1042_v3, %v1041_v1 }
 0x13e   :  { %v1878_v5 = vpop.f32.mrb[12].mxu0  ;;  %v1880_v6 = vpop.f32.mrb[12].mxu1 }
 0x13f   :  { %v847_v7 = vsel %vm835_vm0, %v1878_v5, 0.0  ;;  %v975_v8 = vmul.f32 %v1878_v5, %v1878_v5  ;;  %v604_v9 = vpop.f32.mrb[13].mxu0  ;;  %v732_v10 = vpop.f32.mrb[13].mxu1 }
 0x140   :  { %v848_v11 = vadd.f32 %v847_v7, %v846_v2  ;;  %v1886_v12 = vpop.f32.mrb[14].mxu0  ;;  %v1888_v13 = vpop.f32.mrb[14].mxu1 }
 0x141   :  { %v1044_v14 = vsel %vm835_vm0, %v975_v8, 0.0  ;;  %v849_v15 = vsel %vm835_vm0, %v1886_v12, 0.0  ;;  %v976_v16 = vmul.f32 %v1886_v12, %v1886_v12  ;;  %v607_v19 = vpop.f32.mrb[15].mxu0  ;;  %v735_v20 = vpop.f32.mrb[15].mxu1 }
 0x142   :  { %v1045_v21 = vadd.f32 %v1044_v14, %v1043_v4  ;;  %v850_v24 = vadd.f32 %v849_v15, %v848_v11 }
 0x143   :  { %v1046_v25 = vsel %vm835_vm0, %v976_v16, 0.0 }
 0x144   :  { %v1047_v26 = vadd.f32 %v1046_v25, %v1045_v21 }
 0x146   :  { %v1896_v27 = vpop.f32.mrb[16].mxu0  ;;  %v1898_v28 = vpop.f32.mrb[16].mxu1 }
 0x147   :  { %v851_v29 = vsel %vm835_vm0, %v1896_v27, 0.0  ;;  %v977_v30 = vmul.f32 %v1896_v27, %v1896_v27  ;;  %v612_v31 = vpop.f32.mrb[17].mxu0  ;;  %v740_v32 = vpop.f32.mrb[17].mxu1 }
 0x148   :  { %v852_v35 = vadd.f32 %v851_v29, %v850_v24  ;;  %v1904_v36 = vpop.f32.mrb[18].mxu0  ;;  %v1906_v37 = vpop.f32.mrb[18].mxu1 }
 0x149   :  { %v1048_v38 = vsel %vm835_vm0, %v977_v30, 0.0  ;;  %v853_v39 = vsel %vm835_vm0, %v1904_v36, 0.0  ;;  %v978_v42 = vmul.f32 %v1904_v36, %v1904_v36  ;;  %v615_v43 = vpop.f32.mrb[19].mxu0  ;;  %v743_v44 = vpop.f32.mrb[19].mxu1 }
 0x14a   :  { %v1049_v45 = vadd.f32 %v1048_v38, %v1047_v26  ;;  %v854_v46 = vadd.f32 %v853_v39, %v852_v35 }
 0x14b   :  { %v1050_v47 = vsel %vm835_vm0, %v978_v42, 0.0 }
 0x14c   :  { %v1051_v48 = vadd.f32 %v1050_v47, %v1049_v45 }
 0x14e   :  { %v1914_v49 = vpop.f32.mrb[20].mxu0  ;;  %v1916_v50 = vpop.f32.mrb[20].mxu1 }
 0x14f   :  { %v855_v53 = vsel %vm835_vm0, %v1914_v49, 0.0  ;;  %v979_v54 = vmul.f32 %v1914_v49, %v1914_v49  ;;  %v620_v55 = vpop.f32.mrb[21].mxu0  ;;  %v748_v56 = vpop.f32.mrb[21].mxu1 }
 0x150   :  { %v856_v57 = vadd.f32 %v855_v53, %v854_v46  ;;  %v1922_v60 = vpop.f32.mrb[22].mxu0  ;;  %v1924_v61 = vpop.f32.mrb[22].mxu1 }
 0x151   :  { %v1052_v62 = vsel %vm835_vm0, %v979_v54, 0.0  ;;  %v857_v63 = vsel %vm835_vm0, %v1922_v60, 0.0  ;;  %v980_v0 = vmul.f32 %v1922_v60, %v1922_v60  ;;  %v623_v1 = vpop.f32.mrb[23].mxu0  ;;  %v751_v2 = vpop.f32.mrb[23].mxu1 }
 0x152   :  { %v1053_v3 = vadd.f32 %v1052_v62, %v1051_v48  ;;  %v858_v4 = vadd.f32 %v857_v63, %v856_v57 }
 0x153   :  { %v1054_v7 = vsel %vm835_vm0, %v980_v0, 0.0 }
 0x154   :  { %v1055_v8 = vadd.f32 %v1054_v7, %v1053_v3 }
 0x156   :  { %v1932_v9 = vpop.f32.mrb[24].mxu0  ;;  %v1934_v10 = vpop.f32.mrb[24].mxu1 }
 0x157   :  { %v859_v11 = vsel %vm835_vm0, %v1932_v9, 0.0  ;;  %v981_v14 = vmul.f32 %v1932_v9, %v1932_v9  ;;  %v628_v15 = vpop.f32.mrb[25].mxu0  ;;  %v756_v16 = vpop.f32.mrb[25].mxu1 }
 0x158   :  { %v860_v19 = vadd.f32 %v859_v11, %v858_v4  ;;  %v1940_v20 = vpop.f32.mrb[26].mxu0  ;;  %v1942_v21 = vpop.f32.mrb[26].mxu1 }
 0x159   :  { %v1056_v24 = vsel %vm835_vm0, %v981_v14, 0.0  ;;  %v861_v25 = vsel %vm835_vm0, %v1940_v20, 0.0  ;;  %v982_v26 = vmul.f32 %v1940_v20, %v1940_v20  ;;  %v631_v29 = vpop.f32.mrb[27].mxu0  ;;  %v759_v30 = vpop.f32.mrb[27].mxu1 }
 0x15a   :  { %v1057_v31 = vadd.f32 %v1056_v24, %v1055_v8  ;;  %v862_v32 = vadd.f32 %v861_v25, %v860_v19 }
 0x15b   :  { %v1058_v35 = vsel %vm835_vm0, %v982_v26, 0.0 }
 0x15c   :  { %v1059_v38 = vadd.f32 %v1058_v35, %v1057_v31 }
 0x15e   :  { %v1950_v39 = vpop.f32.mrb[28].mxu0  ;;  %v1952_v42 = vpop.f32.mrb[28].mxu1 }
 0x15f   :  { %3160 = vst [vmem:[#allocation5_spill] sm:$0xff] %v1950_v39  ;;  %v863_v43 = vsel %vm835_vm0, %v1950_v39, 0.0  ;;  %v983_v44 = vmul.f32 %v1950_v39, %v1950_v39  ;;  %v636_v45 = vpop.f32.mrb[29].mxu0  ;;  %v764_v46 = vpop.f32.mrb[29].mxu1  ;;  %v901_v39 = vsel %vm835_vm0, %v1832_v23, 0.0 }
 0x160   :  { %v864_v47 = vadd.f32 %v863_v43, %v862_v32  ;;  %v1958_v48 = vpop.f32.mrb[30].mxu0  ;;  %v1960_v53 = vpop.f32.mrb[30].mxu1 }
 0x161   :  { %3161 = vst [vmem:[#allocation6_spill] sm:$0xff] %v1958_v48  ;;  %v1060_v54 = vsel %vm835_vm0, %v983_v44, 0.0  ;;  %v865_v55 = vsel %vm835_vm0, %v1958_v48, 0.0  ;;  %v984_v56 = vmul.f32 %v1958_v48, %v1958_v48  ;;  %v639_v57 = vpop.f32.mrb[31].mxu0  ;;  %v767_v62 = vpop.f32.mrb[31].mxu1 }
 0x162   :  { %v1061_v63 = vadd.f32 %v1060_v54, %v1059_v38  ;;  %v866_v0 = vadd.f32 %v865_v55, %v864_v47 }
 0x163   :  { %v1062_v1 = vsel %vm835_vm0, %v984_v56, 0.0 }
 0x164   :  { %v1063_v2 = vadd.f32 %v1062_v1, %v1061_v63 }
 0x166   :  { %v1968_v3 = vpop.f32.mrb[32].mxu0  ;;  %v1970_v4 = vpop.f32.mrb[32].mxu1 }
 0x167   :  { %3162 = vst [vmem:[#allocation7_spill] sm:$0xff] %v1968_v3  ;;  %v867_v7 = vsel %vm835_vm0, %v1968_v3, 0.0  ;;  %v985_v8 = vmul.f32 %v1968_v3, %v1968_v3  ;;  %v644_v11 = vpop.f32.mrb[33].mxu0  ;;  %v772_v14 = vpop.f32.mrb[33].mxu1 }
 0x168   :  { %v868_v15 = vadd.f32 %v867_v7, %v866_v0  ;;  %v1976_v16 = vpop.f32.mrb[34].mxu0  ;;  %v1978_v19 = vpop.f32.mrb[34].mxu1 }
 0x169   :  { %3163 = vst [vmem:[#allocation8_spill] sm:$0xff] %v1976_v16  ;;  %v1064_v24 = vsel %vm835_vm0, %v985_v8, 0.0  ;;  %v869_v25 = vsel %vm835_vm0, %v1976_v16, 0.0  ;;  %v986_v26 = vmul.f32 %v1976_v16, %v1976_v16  ;;  %v647_v29 = vpop.f32.mrb[35].mxu0  ;;  %v775_v30 = vpop.f32.mrb[35].mxu1 }
 0x16a   :  { %v1065_v31 = vadd.f32 %v1064_v24, %v1063_v2  ;;  %v870_v32 = vadd.f32 %v869_v25, %v868_v15 }
 0x16b   :  { %v1066_v35 = vsel %vm835_vm0, %v986_v26, 0.0 }
 0x16c   :  { %v1067_v38 = vadd.f32 %v1066_v35, %v1065_v31 }
 0x16e   :  { %v1986_v43 = vpop.f32.mrb[36].mxu0  ;;  %v1988_v44 = vpop.f32.mrb[36].mxu1 }
 0x16f   :  { %3164 = vst [vmem:[#allocation9_spill] sm:$0xff] %v1986_v43  ;;  %v871_v45 = vsel %vm835_vm0, %v1986_v43, 0.0  ;;  %v987_v46 = vmul.f32 %v1986_v43, %v1986_v43  ;;  %v652_v47 = vpop.f32.mrb[37].mxu0  ;;  %v780_v54 = vpop.f32.mrb[37].mxu1 }
 0x170   :  { %v872_v55 = vadd.f32 %v871_v45, %v870_v32  ;;  %v1994_v56 = vpop.f32.mrb[38].mxu0  ;;  %v1996_v57 = vpop.f32.mrb[38].mxu1 }
 0x171   :  { %3165 = vst [vmem:[#allocation10_spill] sm:$0xff] %v1994_v56  ;;  %v1068_v62 = vsel %vm835_vm0, %v987_v46, 0.0  ;;  %v873_v63 = vsel %vm835_vm0, %v1994_v56, 0.0  ;;  %v988_v0 = vmul.f32 %v1994_v56, %v1994_v56  ;;  %v655_v1 = vpop.f32.mrb[39].mxu0  ;;  %v783_v2 = vpop.f32.mrb[39].mxu1 }
 0x172   :  { %v1069_v7 = vadd.f32 %v1068_v62, %v1067_v38  ;;  %v874_v8 = vadd.f32 %v873_v63, %v872_v55 }
 0x173   :  { %v1070_v11 = vsel %vm835_vm0, %v988_v0, 0.0 }
 0x174   :  { %v1071_v14 = vadd.f32 %v1070_v11, %v1069_v7 }
 0x176   :  { %v2004_v15 = vpop.f32.mrb[40].mxu0  ;;  %v2006_v24 = vpop.f32.mrb[40].mxu1 }
 0x177   :  { %3166 = vst [vmem:[#allocation11_spill] sm:$0xff] %v2004_v15  ;;  %v875_v25 = vsel %vm835_vm0, %v2004_v15, 0.0  ;;  %v989_v26 = vmul.f32 %v2004_v15, %v2004_v15  ;;  %v660_v29 = vpop.f32.mrb[41].mxu0  ;;  %v788_v30 = vpop.f32.mrb[41].mxu1 }
 0x178   :  { %v876_v31 = vadd.f32 %v875_v25, %v874_v8  ;;  %v2012_v32 = vpop.f32.mrb[42].mxu0  ;;  %v2014_v35 = vpop.f32.mrb[42].mxu1 }
 0x179   :  { %3167 = vst [vmem:[#allocation12_spill] sm:$0xff] %v2012_v32  ;;  %v1072_v38 = vsel %vm835_vm0, %v989_v26, 0.0  ;;  %v877_v45 = vsel %vm835_vm0, %v2012_v32, 0.0  ;;  %v990_v46 = vmul.f32 %v2012_v32, %v2012_v32  ;;  %v663_v47 = vpop.f32.mrb[43].mxu0  ;;  %v791_v54 = vpop.f32.mrb[43].mxu1 }
 0x17a   :  { %v1073_v55 = vadd.f32 %v1072_v38, %v1071_v14  ;;  %v878_v62 = vadd.f32 %v877_v45, %v876_v31 }
 0x17b   :  { %v1074_v63 = vsel %vm835_vm0, %v990_v46, 0.0 }
 0x17c   :  { %v1075_v0 = vadd.f32 %v1074_v63, %v1073_v55 }
 0x17e   :  { %v2022_v1 = vpop.f32.mrb[44].mxu0  ;;  %v2024_v2 = vpop.f32.mrb[44].mxu1 }
 0x17f   :  { %3168 = vst [vmem:[#allocation13_spill] sm:$0xff] %v2022_v1  ;;  %v879_v7 = vsel %vm835_vm0, %v2022_v1, 0.0  ;;  %v991_v8 = vmul.f32 %v2022_v1, %v2022_v1  ;;  %v668_v11 = vpop.f32.mrb[45].mxu0  ;;  %v796_v25 = vpop.f32.mrb[45].mxu1 }
 0x180   :  { %v880_v26 = vadd.f32 %v879_v7, %v878_v62  ;;  %v2030_v29 = vpop.f32.mrb[46].mxu0  ;;  %v2032_v14 = vpop.f32.mrb[46].mxu1 }
 0x181   :  { %3169 = vst [vmem:[#allocation14_spill] sm:$0xff] %v2030_v29  ;;  %v1076_v30 = vsel %vm835_vm0, %v991_v8, 0.0  ;;  %v881_v31 = vsel %vm835_vm0, %v2030_v29, 0.0  ;;  %v992_v38 = vmul.f32 %v2030_v29, %v2030_v29  ;;  %v671_v45 = vpop.f32.mrb[47].mxu0  ;;  %v799_v46 = vpop.f32.mrb[47].mxu1 }
 0x182   :  { %v1077_v47 = vadd.f32 %v1076_v30, %v1075_v0  ;;  %v882_v54 = vadd.f32 %v881_v31, %v880_v26 }
 0x183   :  { %v1078_v55 = vsel %vm835_vm0, %v992_v38, 0.0 }
 0x184   :  { %v1079_v63 = vadd.f32 %v1078_v55, %v1077_v47 }
 0x186   :  { %v2040_v62 = vpop.f32.mrb[48].mxu0  ;;  %v2042_v7 = vpop.f32.mrb[48].mxu1 }
 0x187   :  { %3170 = vst [vmem:[#allocation15_spill] sm:$0xff] %v2040_v62  ;;  %v883_v8 = vsel %vm835_vm0, %v2040_v62, 0.0  ;;  %v993_v11 = vmul.f32 %v2040_v62, %v2040_v62  ;;  %v676_v25 = vpop.f32.mrb[49].mxu0  ;;  %v804_v1 = vpop.f32.mrb[49].mxu1 }
 0x188   :  { %v884_v29 = vadd.f32 %v883_v8, %v882_v54  ;;  %v2048_v45 = vpop.f32.mrb[50].mxu0  ;;  %v2050_v0 = vpop.f32.mrb[50].mxu1 }
 0x189   :  { %3171 = vst [vmem:[#allocation16_spill] sm:$0xff] %v2048_v45  ;;  %3172 = vst [vmem:[#allocation17_spill] sm:$0xff] %v2050_v0  ;;  %v1080_v26 = vsel %vm835_vm0, %v993_v11, 0.0  ;;  %v885_v30 = vsel %vm835_vm0, %v2048_v45, 0.0  ;;  %v994_v31 = vmul.f32 %v2048_v45, %v2048_v45  ;;  %v679_v38 = vpop.f32.mrb[51].mxu0  ;;  %v807_v46 = vpop.f32.mrb[51].mxu1 }
 0x18a   :  { %v1081_v47 = vadd.f32 %v1080_v26, %v1079_v63  ;;  %v886_v55 = vadd.f32 %v885_v30, %v884_v29 }
 0x18b   :  { %v1082_v25 = vsel %vm835_vm0, %v994_v31, 0.0 }
 0x18c   :  { %v1083_v1 = vadd.f32 %v1082_v25, %v1081_v47 }
 0x18e   :  { %v2058_v54 = vpop.f32.mrb[52].mxu0  ;;  %v2060_v8 = vpop.f32.mrb[52].mxu1 }
 0x18f   :  { %3173 = vst [vmem:[#allocation18_spill] sm:$0xff] %v2058_v54  ;;  %3174 = vst [vmem:[#allocation19_spill] sm:$0xff] %v2060_v8  ;;  %v887_v11 = vsel %vm835_vm0, %v2058_v54, 0.0  ;;  %v995_v62 = vmul.f32 %v2058_v54, %v2058_v54  ;;  %v684_v32 = vpop.f32.mrb[53].mxu0  ;;  %v812_v15 = vpop.f32.mrb[53].mxu1 }
 0x190   :  { %v888_v45 = vadd.f32 %v887_v11, %v886_v55  ;;  %v2066_v38 = vpop.f32.mrb[54].mxu0  ;;  %v2068_v63 = vpop.f32.mrb[54].mxu1 }
 0x191   :  { %3175 = vst [vmem:[#allocation20_spill] sm:$0xff] %v2066_v38  ;;  %3176 = vst [vmem:[#allocation21_spill] sm:$0xff] %v2068_v63  ;;  %v1084_v29 = vsel %vm835_vm0, %v995_v62, 0.0  ;;  %v889_v26 = vsel %vm835_vm0, %v2066_v38, 0.0  ;;  %v996_v30 = vmul.f32 %v2066_v38, %v2066_v38  ;;  %v687_v31 = vpop.f32.mrb[55].mxu0  ;;  %v815_v46 = vpop.f32.mrb[55].mxu1 }
 0x192   :  { %v1085_v47 = vadd.f32 %v1084_v29, %v1083_v1  ;;  %v890_v25 = vadd.f32 %v889_v26, %v888_v45 }
 0x193   :  { %v1086_v32 = vsel %vm835_vm0, %v996_v30, 0.0 }
 0x194   :  { %v1087_v15 = vadd.f32 %v1086_v32, %v1085_v47 }
 0x196   :  { %v2076_v55 = vpop.f32.mrb[56].mxu0  ;;  %v2078_v11 = vpop.f32.mrb[56].mxu1 }
 0x197   :  { %3177 = vst [vmem:[#allocation22_spill] sm:$0xff] %v2076_v55  ;;  %3178 = vst [vmem:[#allocation23_spill] sm:$0xff] %v2078_v11  ;;  %v891_v62 = vsel %vm835_vm0, %v2076_v55, 0.0  ;;  %v997_v54 = vmul.f32 %v2076_v55, %v2076_v55  ;;  %v692_v56 = vpop.f32.mrb[57].mxu0  ;;  %v820_v43 = vpop.f32.mrb[57].mxu1 }
 0x198   :  { %v892_v38 = vadd.f32 %v891_v62, %v890_v25  ;;  %v2084_v31 = vpop.f32.mrb[58].mxu0  ;;  %v2086_v1 = vpop.f32.mrb[58].mxu1 }
 0x199   :  { %3179 = vst [vmem:[#allocation24_spill] sm:$0xff] %v2084_v31  ;;  %3180 = vst [vmem:[#allocation25_spill] sm:$0xff] %v2086_v1  ;;  %v1088_v45 = vsel %vm835_vm0, %v997_v54, 0.0  ;;  %v893_v29 = vsel %vm835_vm0, %v2084_v31, 0.0  ;;  %v998_v26 = vmul.f32 %v2084_v31, %v2084_v31  ;;  %v695_v30 = vpop.f32.mrb[59].mxu0  ;;  %v823_v46 = vpop.f32.mrb[59].mxu1 }
 0x19a   :  { %v1089_v47 = vadd.f32 %v1088_v45, %v1087_v15  ;;  %v894_v32 = vadd.f32 %v893_v29, %v892_v38  ;;  %v1001_v38 = vmul.f32 %v1826_v18, %v1826_v18 }
 0x19b   :  { %v1090_v56 = vsel %vm835_vm0, %v998_v26, 0.0 }
 0x19c   :  { %v1091_v43 = vadd.f32 %v1090_v56, %v1089_v47  ;;  %v1002_v56 = vmul.f32 %v1832_v23, %v1832_v23  ;;  %v1096_v48 = vsel %vm835_vm0, %v1001_v38, 0.0 }
 0x19e   :  { %v2094_v25 = vpop.f32.mrb[60].mxu0  ;;  %v2096_v62 = vpop.f32.mrb[60].mxu1 }
 0x19f   :  { %3181 = vst [vmem:[#allocation26_spill] sm:$0xff] %v2094_v25  ;;  %3182 = vst [vmem:[#allocation27_spill] sm:$0xff] %v2096_v62  ;;  %v895_v54 = vsel %vm835_vm0, %v2094_v25, 0.0  ;;  %v999_v55 = vmul.f32 %v2094_v25, %v2094_v25  ;;  %v700_v16 = vpop.f32.mrb[61].mxu0  ;;  %v828_v3 = vpop.f32.mrb[61].mxu1 }
 0x1a0   :  { %v896_v31 = vadd.f32 %v895_v54, %v894_v32  ;;  %v2102_v30 = vpop.f32.mrb[62].mxu0  ;;  %v2104_v15 = vpop.f32.mrb[62].mxu1  ;;  %v899_v32 = vsel %vm835_vm0, %v1826_v18, 0.0 }
 0x1a1   :  { %3183 = vst [vmem:[#allocation28_spill] sm:$0xff] %v2104_v15  ;;  %v1092_v45 = vsel %vm835_vm0, %v999_v55, 0.0  ;;  %v897_v29 = vsel %vm835_vm0, %v2102_v30, 0.0  ;;  %v1000_v26 = vmul.f32 %v2102_v30, %v2102_v30  ;;  %v703_v46 = vpop.f32.mrb[63].mxu0  ;;  %v831_v47 = vpop.f32.mrb[63].mxu1 }
 0x1a2   :  { %v1093_v16 = vadd.f32 %v1092_v45, %v1091_v43  ;;  %v898_v3 = vadd.f32 %v897_v29, %v896_v31  ;;  %v1003_v46 = vmul.f32 %v1844_v34, %v1844_v34  ;;  %v1098_v45 = vsel %vm835_vm0, %v1002_v56, 0.0 }
 0x1a3   :  { %v1094_v54 = vsel %vm835_vm0, %v1000_v26, 0.0  ;;  %v903_v29 = vsel %vm835_vm0, %v1844_v34, 0.0  ;;  %v1004_v26 = vmul.f32 %v1852_v41, %v1852_v41  ;;  %v907_v56 = vsel %vm835_vm0, %v1862_v52, 0.0 }
 0x1a4   :  { %v900_v25 = vadd.f32 %v899_v32, %v898_v3  ;;  %v1095_v55 = vadd.f32 %v1094_v54, %v1093_v16  ;;  %v1100_v38 = vsel %vm835_vm0, %v1003_v46, 0.0  ;;  %v905_v3 = vsel %vm835_vm0, %v1852_v41, 0.0 }
 0x1a5   :  { %v1005_v32 = vmul.f32 %v1862_v52, %v1862_v52  ;;  %v1006_v54 = vmul.f32 %v1870_v59, %v1870_v59 }
 0x1a6   :  { %v902_v43 = vadd.f32 %v901_v39, %v900_v25  ;;  %v1097_v31 = vadd.f32 %v1096_v48, %v1095_v55  ;;  %v1102_v25 = vsel %vm835_vm0, %v1004_v26, 0.0 }
 0x1a7   :  { %v1104_v46 = vsel %vm835_vm0, %v1005_v32, 0.0  ;;  %v1106_v26 = vsel %vm835_vm0, %v1006_v54, 0.0 }
 0x1a8   :  { %v904_v47 = vadd.f32 %v903_v29, %v902_v43  ;;  %v1099_v16 = vadd.f32 %v1098_v45, %v1097_v31  ;;  %v909_v31 = vsel %vm835_vm0, %v1870_v59, 0.0  ;;  %v1007_v45 = vmul.f32 %v1880_v6, %v1880_v6 }
 0x1aa   :  { %v906_v39 = vadd.f32 %v905_v3, %v904_v47  ;;  %v1101_v48 = vadd.f32 %v1100_v38, %v1099_v16  ;;  %v911_v16 = vsel %vm835_vm0, %v1880_v6, 0.0  ;;  %v1008_v38 = vmul.f32 %v1888_v13, %v1888_v13 }
 0x1ab   :  { %v1108_v32 = vsel %vm835_vm0, %v1007_v45, 0.0 }
 0x1ac   :  { %v908_v55 = vadd.f32 %v907_v56, %v906_v39  ;;  %v1103_v43 = vadd.f32 %v1102_v25, %v1101_v48  ;;  %v913_v48 = vsel %vm835_vm0, %v1888_v13, 0.0  ;;  %v1009_v25 = vmul.f32 %v1898_v28, %v1898_v28 }
 0x1ad   :  { %v1110_v54 = vsel %vm835_vm0, %v1008_v38, 0.0 }
 0x1ae   :  { %v910_v29 = vadd.f32 %v909_v31, %v908_v55  ;;  %v1105_v47 = vadd.f32 %v1104_v46, %v1103_v43  ;;  %v915_v43 = vsel %vm835_vm0, %v1898_v28, 0.0  ;;  %v1010_v46 = vmul.f32 %v1906_v37, %v1906_v37 }
 0x1af   :  { %v1112_v45 = vsel %vm835_vm0, %v1009_v25, 0.0 }
 0x1b0   :  { %v912_v3 = vadd.f32 %v911_v16, %v910_v29  ;;  %v1107_v39 = vadd.f32 %v1106_v26, %v1105_v47  ;;  %v917_v47 = vsel %vm835_vm0, %v1906_v37, 0.0  ;;  %v1011_v26 = vmul.f32 %v1916_v50, %v1916_v50 }
 0x1b1   :  { %v1114_v38 = vsel %vm835_vm0, %v1010_v46, 0.0 }
 0x1b2   :  { %v914_v56 = vadd.f32 %v913_v48, %v912_v3  ;;  %v1109_v55 = vadd.f32 %v1108_v32, %v1107_v39  ;;  %v919_v39 = vsel %vm835_vm0, %v1916_v50, 0.0  ;;  %v1012_v32 = vmul.f32 %v1924_v61, %v1924_v61 }
 0x1b3   :  { %v1116_v25 = vsel %vm835_vm0, %v1011_v26, 0.0 }
 0x1b4   :  { %v1111_v31 = vadd.f32 %v1110_v54, %v1109_v55  ;;  %v916_v29 = vadd.f32 %v915_v43, %v914_v56  ;;  %v921_v55 = vsel %vm835_vm0, %v1924_v61, 0.0  ;;  %v1013_v54 = vmul.f32 %v1934_v10, %v1934_v10 }
 0x1b5   :  { %v1118_v46 = vsel %vm835_vm0, %v1012_v32, 0.0 }
 0x1b6   :  { %v918_v16 = vadd.f32 %v917_v47, %v916_v29  ;;  %v1113_v3 = vadd.f32 %v1112_v45, %v1111_v31  ;;  %v923_v29 = vsel %vm835_vm0, %v1934_v10, 0.0  ;;  %v1014_v45 = vmul.f32 %v1942_v21, %v1942_v21 }
 0x1b7   :  { %v1120_v26 = vsel %vm835_vm0, %v1013_v54, 0.0 }
 0x1b8   :  { %v920_v48 = vadd.f32 %v919_v39, %v918_v16  ;;  %v1115_v56 = vadd.f32 %v1114_v38, %v1113_v3  ;;  %v925_v3 = vsel %vm835_vm0, %v1942_v21, 0.0  ;;  %v1015_v38 = vmul.f32 %v1952_v42, %v1952_v42 }
 0x1b9   :  { %v1122_v32 = vsel %vm835_vm0, %v1014_v45, 0.0 }
 0x1ba   :  { %v922_v43 = vadd.f32 %v921_v55, %v920_v48  ;;  %v1117_v31 = vadd.f32 %v1116_v25, %v1115_v56  ;;  %v927_v56 = vsel %vm835_vm0, %v1952_v42, 0.0  ;;  %v1016_v25 = vmul.f32 %v1960_v53, %v1960_v53 }
 0x1bb   :  { %v1124_v54 = vsel %vm835_vm0, %v1015_v38, 0.0 }
 0x1bc   :  { %v924_v47 = vadd.f32 %v923_v29, %v922_v43  ;;  %v1119_v16 = vadd.f32 %v1118_v46, %v1117_v31  ;;  %v929_v31 = vsel %vm835_vm0, %v1960_v53, 0.0  ;;  %v1017_v46 = vmul.f32 %v1970_v4, %v1970_v4 }
 0x1bd   :  { %v1126_v45 = vsel %vm835_vm0, %v1016_v25, 0.0 }
 0x1be   :  { %v926_v39 = vadd.f32 %v925_v3, %v924_v47  ;;  %v1121_v48 = vadd.f32 %v1120_v26, %v1119_v16  ;;  %v931_v16 = vsel %vm835_vm0, %v1970_v4, 0.0  ;;  %v1018_v26 = vmul.f32 %v1978_v19, %v1978_v19 }
 0x1bf   :  { %v1128_v38 = vsel %vm835_vm0, %v1017_v46, 0.0 }
 0x1c0   :  { %v928_v55 = vadd.f32 %v927_v56, %v926_v39  ;;  %v1123_v43 = vadd.f32 %v1122_v32, %v1121_v48  ;;  %v933_v48 = vsel %vm835_vm0, %v1978_v19, 0.0  ;;  %v1019_v32 = vmul.f32 %v1988_v44, %v1988_v44 }
 0x1c1   :  { %v1130_v25 = vsel %vm835_vm0, %v1018_v26, 0.0 }
 0x1c2   :  { %v930_v29 = vadd.f32 %v929_v31, %v928_v55  ;;  %v1125_v47 = vadd.f32 %v1124_v54, %v1123_v43  ;;  %v935_v43 = vsel %vm835_vm0, %v1988_v44, 0.0  ;;  %v1020_v54 = vmul.f32 %v1996_v57, %v1996_v57 }
 0x1c3   :  { %v1132_v46 = vsel %vm835_vm0, %v1019_v32, 0.0 }
 0x1c4   :  { %v932_v3 = vadd.f32 %v931_v16, %v930_v29  ;;  %v1127_v39 = vadd.f32 %v1126_v45, %v1125_v47  ;;  %v937_v47 = vsel %vm835_vm0, %v1996_v57, 0.0  ;;  %v1021_v45 = vmul.f32 %v2006_v24, %v2006_v24 }
 0x1c5   :  { %v1134_v26 = vsel %vm835_vm0, %v1020_v54, 0.0 }
 0x1c6   :  { %v1129_v56 = vadd.f32 %v1128_v38, %v1127_v39  ;;  %v934_v55 = vadd.f32 %v933_v48, %v932_v3  ;;  %v939_v39 = vsel %vm835_vm0, %v2006_v24, 0.0  ;;  %v1022_v38 = vmul.f32 %v2014_v35, %v2014_v35 }
 0x1c7   :  { %v1136_v32 = vsel %vm835_vm0, %v1021_v45, 0.0 }
 0x1c8   :  { %v1131_v31 = vadd.f32 %v1130_v25, %v1129_v56  ;;  %v936_v29 = vadd.f32 %v935_v43, %v934_v55  ;;  %v941_v55 = vsel %vm835_vm0, %v2014_v35, 0.0  ;;  %v1023_v25 = vmul.f32 %v2024_v2, %v2024_v2 }
 0x1c9   :  { %v1138_v54 = vsel %vm835_vm0, %v1022_v38, 0.0 }
 0x1ca   :  { %v1133_v16 = vadd.f32 %v1132_v46, %v1131_v31  ;;  %v938_v3 = vadd.f32 %v937_v47, %v936_v29  ;;  %v943_v29 = vsel %vm835_vm0, %v2024_v2, 0.0  ;;  %v1024_v46 = vmul.f32 %v2032_v14, %v2032_v14 }
 0x1cb   :  { %v1140_v45 = vsel %vm835_vm0, %v1023_v25, 0.0 }
 0x1cc   :  { %v1135_v48 = vadd.f32 %v1134_v26, %v1133_v16  ;;  %v940_v56 = vadd.f32 %v939_v39, %v938_v3  ;;  %v945_v3 = vsel %vm835_vm0, %v2032_v14, 0.0  ;;  %v1025_v26 = vmul.f32 %v2042_v7, %v2042_v7 }
 0x1cd   :  { %v1142_v38 = vsel %vm835_vm0, %v1024_v46, 0.0 }
 0x1ce   :  { %v1137_v43 = vadd.f32 %v1136_v32, %v1135_v48  ;;  %v942_v31 = vadd.f32 %v941_v55, %v940_v56  ;;  %v947_v56 = vsel %vm835_vm0, %v2042_v7, 0.0  ;;  %v1026_v32 = vmul.f32 %v2050_v0, %v2050_v0 }
 0x1cf   :  { %v1144_v25 = vsel %vm835_vm0, %v1025_v26, 0.0 }
 0x1d0   :  { %v1139_v47 = vadd.f32 %v1138_v54, %v1137_v43  ;;  %v944_v16 = vadd.f32 %v943_v29, %v942_v31  ;;  %v949_v31 = vsel %vm835_vm0, %v2050_v0, 0.0  ;;  %v1027_v54 = vmul.f32 %v2060_v8, %v2060_v8 }
 0x1d1   :  { %v1146_v46 = vsel %vm835_vm0, %v1026_v32, 0.0 }
 0x1d2   :  { %v1141_v39 = vadd.f32 %v1140_v45, %v1139_v47  ;;  %v946_v48 = vadd.f32 %v945_v3, %v944_v16  ;;  %v951_v16 = vsel %vm835_vm0, %v2060_v8, 0.0  ;;  %v1028_v45 = vmul.f32 %v2068_v63, %v2068_v63 }
 0x1d3   :  { %v1148_v26 = vsel %vm835_vm0, %v1027_v54, 0.0 }
 0x1d4   :  { %v1143_v55 = vadd.f32 %v1142_v38, %v1141_v39  ;;  %v948_v43 = vadd.f32 %v947_v56, %v946_v48  ;;  %v953_v48 = vsel %vm835_vm0, %v2068_v63, 0.0  ;;  %v1029_v38 = vmul.f32 %v2078_v11, %v2078_v11 }
 0x1d5   :  { %v1150_v32 = vsel %vm835_vm0, %v1028_v45, 0.0 }
 0x1d6   :  { %v1145_v29 = vadd.f32 %v1144_v25, %v1143_v55  ;;  %v950_v47 = vadd.f32 %v949_v31, %v948_v43  ;;  %v955_v43 = vsel %vm835_vm0, %v2078_v11, 0.0  ;;  %v1030_v25 = vmul.f32 %v2086_v1, %v2086_v1 }
 0x1d7   :  { %v1031_v31 = vmul.f32 %v2096_v62, %v2096_v62 }
 0x1d8   :  { %v1147_v3 = vadd.f32 %v1146_v46, %v1145_v29  ;;  %v952_v39 = vadd.f32 %v951_v16, %v950_v47  ;;  %v1152_v47 = vsel %vm835_vm0, %v1029_v38, 0.0  ;;  %v957_v46 = vsel %vm835_vm0, %v2086_v1, 0.0 }
 0x1d9   :  { %v959_v16 = vsel %vm835_vm0, %v2096_v62, 0.0  ;;  %v961_v38 = vsel %vm835_vm0, %v2104_v15, 0.0 }
 0x1da   :  { %v1149_v56 = vadd.f32 %v1148_v26, %v1147_v3  ;;  %v954_v55 = vadd.f32 %v953_v48, %v952_v39  ;;  %v1154_v39 = vsel %vm835_vm0, %v1030_v25, 0.0  ;;  %v1156_v26 = vsel %vm835_vm0, %v1031_v31, 0.0 }
 0x1db   :  { %v1032_v48 = vmul.f32 %v2104_v15, %v2104_v15 }
 0x1dc   :  { %v1151_v54 = vadd.f32 %v1150_v32, %v1149_v56  ;;  %v956_v29 = vadd.f32 %v955_v43, %v954_v55 }
 0x1dd   :  { %v1158_v43 = vsel %vm835_vm0, %v1032_v48, 0.0  ;;  %v1177_v48 = vlaneseq }
 0x1de   :  { %v1153_v45 = vadd.f32 %v1152_v47, %v1151_v54  ;;  %v958_v3 = vadd.f32 %v957_v46, %v956_v29 }
 0x1e0   :  { %v1155_v11 = vadd.f32 %v1154_v39, %v1153_v45  ;;  %v960_v56 = vadd.f32 %v959_v16, %v958_v3 }
 0x1e2   :  { %v1157_v55 = vadd.f32 %v1156_v26, %v1155_v11  ;;  %v962_v32 = vadd.f32 %v961_v38, %v960_v56  ;;  %v2272_v38 = vshrl.u32 %v1177_v48, 7  ;;  %v3191_v48 = vld [vmem:[#allocation12_spill] sm:$0xff] }
 0x1e4   :  { %v963_v1 = vrot.slane %v962_v32, 4  ;;  %v1159_v62 = vadd.f32 %v1158_v43, %v1157_v55 }
 0x1e6   :  { %v964_v54 = vadd.f32 %v963_v1, %v962_v32  ;;  %v1160_v29 = vrot.slane %v1159_v62, 4  ;;  %v833_v1 = vld [vmem:[%s3132_s2] sm:$0x1]  ;;  %v3199_v32 = vld [vmem:[#allocation20_spill] sm:$0xff] }
 0x1e8   :  { %v965_v47 = vrot.slane %v964_v54, 2  ;;  %v1161_v25 = vadd.f32 %v1160_v29, %v1159_v62  ;;  %v3159_v62 = vsub.s32 0, %v2272_v38 }
 0x1ea   :  { %v966_v46 = vadd.f32 %v965_v47, %v964_v54  ;;  %v1162_v31 = vrot.slane %v1161_v25, 2 }
 0x1ec   :  { %v967_v63 = vrot.slane %v966_v46, 1  ;;  %v1163_v8 = vadd.f32 %v1162_v31, %v1161_v25  ;;  %v3185_v31 = vld [vmem:[#allocation6_spill] sm:$0xff] }
 0x1ee   :  { %v968_v0 = vadd.f32 %v967_v63, %v966_v46  ;;  %v1164_v45 = vrot.slane %v1163_v8, 1  ;;  %v3184_v46 = vld [vmem:[#allocation5_spill] sm:$0xff] }
 0x1f0   :  { %v1165_v16 = vadd.f32 %v1164_v45, %v1163_v8  ;;  %v1166_v3 = vmul.f32 0.001953125, %v968_v0  ;;  %v2281_v0 = vld [vmem:[%s3133_s3] sm:$0x1]  ;;  %v3186_v45 = vld [vmem:[#allocation7_spill] sm:$0xff] }
 0x1f2   :  { %v1167_v39 = vmul.f32 0.001953125, %v1165_v16  ;;  %v1168_v15 = vmul.f32 %v1166_v3, %v1166_v3  ;;  %v3187_v16 = vld [vmem:[#allocation8_spill] sm:$0xff] }
 0x1f4   :  { %v1169_v11 = vsub.f32 %v1167_v39, %v1168_v15  ;;  %v3189_v39 = vld [vmem:[#allocation10_spill] sm:$0xff] }
 0x1f6   :  { %v1170_v26 = vmax.f32 %v1169_v11, 0.0 }
 0x1f8   :  { %v1171_v56 = vadd.f32 1e-05, %v1170_v26  ;;  %v3190_v26 = vld [vmem:[#allocation11_spill] sm:$0xff] }
 0x1fa   :  { %1677 = vrsqrt.f32 %v1171_v56 }
 0x204   :  { %v1678_v55 = vpop.eup %1677 }
 0x205   :  { %v1173_v63 = vmul.f32 %v1678_v55, %v833_v1  ;;  %v3192_v55 = vld [vmem:[#allocation13_spill] sm:$0xff] }
 0x207   :  { %v2283_v8 = vmul.f32 %v1173_v63, %v1166_v3  ;;  %v2287_v15 = vrot.slane %v1173_v63, %v3159_v62  ;;  %v3188_v3 = vld [vmem:[#allocation9_spill] sm:$0xff]  ;;  %v3200_v62 = vld [vmem:[#allocation22_spill] sm:$0xff] }
 0x209   :  { %v2293_v43 = vmul.f32 %v2287_v15, %v1824_v17  ;;  %v2297_v54 = vmul.f32 %v2287_v15, %v1830_v22  ;;  %v2301_v29 = vmul.f32 %v2287_v15, %v1842_v33  ;;  %v2305_v47 = vmul.f32 %v2287_v15, %v1850_v40 }
 0x20a   :  { %v2309_v25 = vmul.f32 %v2287_v15, %v1860_v51  ;;  %v2313_v17 = vmul.f32 %v2287_v15, %v1868_v58  ;;  %v2317_v22 = vmul.f32 %v2287_v15, %v1878_v5  ;;  %v2321_v33 = vmul.f32 %v2287_v15, %v1886_v12 }
 0x20b   :  { %v2325_v40 = vmul.f32 %v2287_v15, %v1896_v27  ;;  %v2329_v51 = vmul.f32 %v2287_v15, %v1904_v36  ;;  %v2333_v58 = vmul.f32 %v2287_v15, %v1914_v49  ;;  %v2337_v5 = vmul.f32 %v2287_v15, %v1922_v60 }
 0x20c   :  { %v2341_v12 = vmul.f32 %v2287_v15, %v1932_v9  ;;  %v2345_v27 = vmul.f32 %v2287_v15, %v1940_v20  ;;  %v2349_v36 = vmul.f32 %v2287_v15, %v3184_v46  ;;  %v2353_v49 = vmul.f32 %v2287_v15, %v3185_v31  ;;  %v3193_v46 = vld [vmem:[#allocation14_spill] sm:$0xff] }
 0x20d   :  { %v2357_v60 = vmul.f32 %v2287_v15, %v3186_v45  ;;  %v2361_v9 = vmul.f32 %v2287_v15, %v3187_v16  ;;  %v2365_v20 = vmul.f32 %v2287_v15, %v3188_v3  ;;  %v2369_v11 = vmul.f32 %v2287_v15, %v3189_v39  ;;  %v3195_v45 = vld [vmem:[#allocation15_spill] sm:$0xff]  ;;  %v3197_v3 = vld [vmem:[#allocation16_spill] sm:$0xff] }
 0x20e   :  { %v2373_v56 = vmul.f32 %v2287_v15, %v3190_v26  ;;  %v2377_v1 = vmul.f32 %v2287_v15, %v3191_v48  ;;  %v2381_v63 = vmul.f32 %v2287_v15, %v3192_v55  ;;  %v2385_v31 = vmul.f32 %v2287_v15, %v3193_v46  ;;  %v3198_v26 = vld [vmem:[#allocation18_spill] sm:$0xff] }
 0x20f   :  { %v2389_v16 = vmul.f32 %v2287_v15, %v3195_v45  ;;  %v2393_v39 = vmul.f32 %v2287_v15, %v3197_v3  ;;  %v2397_v48 = vmul.f32 %v2287_v15, %v3198_v26  ;;  %v2401_v55 = vmul.f32 %v2287_v15, %v3199_v32 }
 0x210   :  { %3194 = vst [vmem:[#allocation5_spill] sm:$0xff] %v2385_v31  ;;  %v2405_v46 = vmul.f32 %v2287_v15, %v3200_v62  ;;  %v3201_v31 = vld [vmem:[#allocation24_spill] sm:$0xff]  ;;  %v2417_v26 = vmul.f32 %v2287_v15, %v2102_v30  ;;  %v2421_v32 = vmul.f32 %v2287_v15, %v1826_v18  ;;  %v2425_v62 = vmul.f32 %v2287_v15, %v1832_v23 }
 0x211   :  { %3196 = vst [vmem:[#allocation6_spill] sm:$0xff] %v2389_v16  ;;  %v2409_v45 = vmul.f32 %v2287_v15, %v3201_v31  ;;  %v3202_v16 = vld [vmem:[#allocation26_spill] sm:$0xff]  ;;  %v2429_v31 = vmul.f32 %v2287_v15, %v1844_v34  ;;  %v2437_v30 = vmul.f32 %v2287_v15, %v1862_v52  ;;  %v2441_v18 = vmul.f32 %v2287_v15, %v1870_v59 }
 0x212   :  { %v2413_v3 = vmul.f32 %v2287_v15, %v3202_v16  ;;  %v2433_v16 = vmul.f32 %v2287_v15, %v1852_v41  ;;  %v2445_v23 = vmul.f32 %v2287_v15, %v1880_v6  ;;  %v2449_v34 = vmul.f32 %v2287_v15, %v1888_v13 }
 0x213   :  { %v2453_v41 = vmul.f32 %v2287_v15, %v1898_v28  ;;  %v2457_v52 = vmul.f32 %v2287_v15, %v1906_v37  ;;  %v2461_v59 = vmul.f32 %v2287_v15, %v1916_v50  ;;  %v2465_v6 = vmul.f32 %v2287_v15, %v1924_v61 }
 0x214   :  { %v2469_v13 = vmul.f32 %v2287_v15, %v1934_v10  ;;  %v2473_v28 = vmul.f32 %v2287_v15, %v1942_v21  ;;  %v2477_v37 = vmul.f32 %v2287_v15, %v1952_v42  ;;  %v2481_v50 = vmul.f32 %v2287_v15, %v1960_v53 }
 0x215   :  { %v2485_v61 = vmul.f32 %v2287_v15, %v1970_v4  ;;  %v2489_v10 = vmul.f32 %v2287_v15, %v1978_v19  ;;  %v2493_v21 = vmul.f32 %v2287_v15, %v1988_v44  ;;  %v2497_v42 = vmul.f32 %v2287_v15, %v1996_v57 }
 0x216   :  { %v2501_v53 = vmul.f32 %v2287_v15, %v2006_v24  ;;  %v2505_v4 = vmul.f32 %v2287_v15, %v2014_v35  ;;  %v2509_v19 = vmul.f32 %v2287_v15, %v2024_v2  ;;  %v2513_v44 = vmul.f32 %v2287_v15, %v2032_v14 }
 0x217   :  { %3203 = vst [vmem:[#allocation7_spill] sm:$0xff] %v2497_v42  ;;  %v2517_v57 = vmul.f32 %v2287_v15, %v2042_v7  ;;  %v3209_v42 = vld [vmem:[#allocation17_spill] sm:$0xff] }
 0x218   :  { %3204 = vst [vmem:[#allocation8_spill] sm:$0xff] %v2501_v53  ;;  %3205 = vst [vmem:[#allocation9_spill] sm:$0xff] %v2505_v4  ;;  %v2521_v24 = vmul.f32 %v2287_v15, %v3209_v42  ;;  %v3211_v53 = vld [vmem:[#allocation19_spill] sm:$0xff]  ;;  %v3213_v4 = vld [vmem:[#allocation21_spill] sm:$0xff] }
 0x219   :  { %3206 = vst [vmem:[#allocation10_spill] sm:$0xff] %v2509_v19  ;;  %3207 = vst [vmem:[#allocation11_spill] sm:$0xff] %v2513_v44  ;;  %v2525_v35 = vmul.f32 %v2287_v15, %v3211_v53  ;;  %v2529_v2 = vmul.f32 %v2287_v15, %v3213_v4  ;;  %v3215_v19 = vld [vmem:[#allocation23_spill] sm:$0xff]  ;;  %v3216_v44 = vld [vmem:[#allocation25_spill] sm:$0xff]  ;;  %v3220_v4 = vsub.f32 %v2281_v0, %v2283_v8 }
 0x21a   :  { %3208 = vst [vmem:[#allocation12_spill] sm:$0xff] %v2517_v57  ;;  %3210 = vst [vmem:[#allocation13_spill] sm:$0xff] %v2521_v24  ;;  %v2533_v14 = vmul.f32 %v2287_v15, %v3215_v19  ;;  %v2537_v7 = vmul.f32 %v2287_v15, %v3216_v44  ;;  %v3217_v57 = vld [vmem:[#allocation27_spill] sm:$0xff]  ;;  %v3218_v24 = vld [vmem:[#allocation28_spill] sm:$0xff] }
 0x21b   :  { %3212 = vst [vmem:[#allocation14_spill] sm:$0xff] %v2525_v35  ;;  %3214 = vst [vmem:[#allocation15_spill] sm:$0xff] %v2529_v2  ;;  %v2541_v42 = vmul.f32 %v2287_v15, %v3217_v57  ;;  %v2545_v53 = vmul.f32 %v2287_v15, %v3218_v24  ;;  %v3219_v35 = vsub.s32 0, %v2272_v38 }
 0x21d   :  { %v2552_v2 = vrot.slane %v3220_v4, %v3219_v35 }
 0x21e   :  { %v3226_v4 = vld [vmem:[#allocation7_spill] sm:$0xff] }
 0x21f   :  { %v2556_v19 = vadd.f32 %v2552_v2, %v2293_v43  ;;  %v2560_v44 = vadd.f32 %v2552_v2, %v2297_v54  ;;  %v2564_v57 = vadd.f32 %v2552_v2, %v2301_v29  ;;  %v2568_v38 = vadd.f32 %v2552_v2, %v2305_v47 }
 0x220   :  { %v2572_v0 = vadd.f32 %v2552_v2, %v2309_v25  ;;  %v2576_v8 = vadd.f32 %v2552_v2, %v2313_v17  ;;  %v2580_v15 = vadd.f32 %v2552_v2, %v2317_v22  ;;  %v2584_v43 = vadd.f32 %v2552_v2, %v2321_v33 }
 0x221   :  { %v2588_v54 = vadd.f32 %v2552_v2, %v2325_v40  ;;  %v2592_v29 = vadd.f32 %v2552_v2, %v2329_v51  ;;  %v2596_v47 = vadd.f32 %v2552_v2, %v2333_v58  ;;  %v2600_v25 = vadd.f32 %v2552_v2, %v2337_v5 }
 0x222   :  { %v2604_v17 = vadd.f32 %v2552_v2, %v2341_v12  ;;  %v2608_v22 = vadd.f32 %v2552_v2, %v2345_v27  ;;  %v2612_v33 = vadd.f32 %v2552_v2, %v2349_v36  ;;  %v2616_v40 = vadd.f32 %v2552_v2, %v2353_v49 }
 0x223   :  { %v2620_v51 = vadd.f32 %v2552_v2, %v2357_v60  ;;  %v2624_v58 = vadd.f32 %v2552_v2, %v2361_v9  ;;  %v2628_v5 = vadd.f32 %v2552_v2, %v2365_v20  ;;  %v2632_v12 = vadd.f32 %v2552_v2, %v2369_v11  ;;  %v3221_v60 = vld [vmem:[#allocation5_spill] sm:$0xff]  ;;  %v3222_v20 = vld [vmem:[#allocation6_spill] sm:$0xff] }
 0x224   :  { %v2636_v27 = vadd.f32 %v2552_v2, %v2373_v56  ;;  %v2640_v36 = vadd.f32 %v2552_v2, %v2377_v1  ;;  %v2644_v49 = vadd.f32 %v2552_v2, %v2381_v63  ;;  %v2648_v9 = vadd.f32 %v2552_v2, %v3221_v60  ;;  %v3228_v60 = vld [vmem:[#allocation8_spill] sm:$0xff] }
 0x225   :  { %v2652_v11 = vadd.f32 %v2552_v2, %v3222_v20  ;;  %v2656_v56 = vadd.f32 %v2552_v2, %v2393_v39  ;;  %v2660_v1 = vadd.f32 %v2552_v2, %v2397_v48  ;;  %v2664_v63 = vadd.f32 %v2552_v2, %v2401_v55  ;;  %v3230_v20 = vld [vmem:[#allocation9_spill] sm:$0xff] }
 0x226   :  { %v2668_v24 = vadd.f32 %v2552_v2, %v2405_v46  ;;  %v2672_v35 = vadd.f32 %v2552_v2, %v2409_v45  ;;  %v2676_v39 = vadd.f32 %v2552_v2, %v2413_v3  ;;  %v2680_v48 = vadd.f32 %v2552_v2, %v2417_v26 }
 0x227   :  { %v2684_v55 = vadd.f32 %v2552_v2, %v2421_v32  ;;  %v2688_v46 = vadd.f32 %v2552_v2, %v2425_v62  ;;  %v2692_v45 = vadd.f32 %v2552_v2, %v2429_v31  ;;  %v2696_v3 = vadd.f32 %v2552_v2, %v2433_v16 }
 0x228   :  { %v2700_v26 = vadd.f32 %v2552_v2, %v2437_v30  ;;  %v2704_v32 = vadd.f32 %v2552_v2, %v2441_v18  ;;  %v2708_v62 = vadd.f32 %v2552_v2, %v2445_v23  ;;  %v2712_v31 = vadd.f32 %v2552_v2, %v2449_v34 }
 0x229   :  { %v2716_v16 = vadd.f32 %v2552_v2, %v2453_v41  ;;  %v2720_v30 = vadd.f32 %v2552_v2, %v2457_v52  ;;  %v2724_v18 = vadd.f32 %v2552_v2, %v2461_v59  ;;  %v2728_v23 = vadd.f32 %v2552_v2, %v2465_v6 }
 0x22a   :  { %v2732_v34 = vadd.f32 %v2552_v2, %v2469_v13  ;;  %v2736_v41 = vadd.f32 %v2552_v2, %v2473_v28  ;;  %v2740_v52 = vadd.f32 %v2552_v2, %v2477_v37  ;;  %v2744_v59 = vadd.f32 %v2552_v2, %v2481_v50 }
 0x22b   :  { %v2748_v6 = vadd.f32 %v2552_v2, %v2485_v61  ;;  %v2752_v13 = vadd.f32 %v2552_v2, %v2489_v10  ;;  %v2756_v28 = vadd.f32 %v2552_v2, %v2493_v21  ;;  %v2760_v37 = vadd.f32 %v2552_v2, %v3226_v4 }
 0x22c   :  { %v2764_v50 = vadd.f32 %v2552_v2, %v3228_v60  ;;  %v2768_v61 = vadd.f32 %v2552_v2, %v3230_v20 }
 0x22d   :  { %3223 = vst [vmem:[#allocation16_spill] sm:$0xff] %v2748_v6  ;;  %3224 = vst [vmem:[#allocation18_spill] sm:$0xff] %v2752_v13  ;;  %v3232_v6 = vld [vmem:[#allocation10_spill] sm:$0xff]  ;;  %v3233_v13 = vld [vmem:[#allocation11_spill] sm:$0xff] }
 0x22e   :  { %3225 = vst [vmem:[#allocation20_spill] sm:$0xff] %v2756_v28  ;;  %3227 = vst [vmem:[#allocation22_spill] sm:$0xff] %v2760_v37  ;;  %v2772_v10 = vadd.f32 %v2552_v2, %v3232_v6  ;;  %v2776_v21 = vadd.f32 %v2552_v2, %v3233_v13  ;;  %v3234_v28 = vld [vmem:[#allocation12_spill] sm:$0xff]  ;;  %v3235_v37 = vld [vmem:[#allocation13_spill] sm:$0xff]  ;;  %v2796_v13 = vadd.f32 %v2552_v2, %v2533_v14  ;;  %v1319_v14 = vmax.f32 %v2568_v38, 0.0 }
 0x22f   :  { %3229 = vst [vmem:[#allocation24_spill] sm:$0xff] %v2764_v50  ;;  %3231 = vst [vmem:[#allocation26_spill] sm:$0xff] %v2768_v61  ;;  %v2780_v4 = vadd.f32 %v2552_v2, %v3234_v28  ;;  %v2784_v60 = vadd.f32 %v2552_v2, %v3235_v37  ;;  %v3236_v50 = vld [vmem:[#allocation14_spill] sm:$0xff]  ;;  %v3238_v61 = vld [vmem:[#allocation15_spill] sm:$0xff]  ;;  %v2800_v28 = vadd.f32 %v2552_v2, %v2537_v7  ;;  %v1321_v7 = vmax.f32 %v2576_v8, 0.0 }
 0x230   :  { %v2788_v20 = vadd.f32 %v2552_v2, %v3236_v50  ;;  %v2792_v6 = vadd.f32 %v2552_v2, %v3238_v61  ;;  %3240 = vst [vmem:[#allocation21_spill] sm:$0xff] %v2796_v13  ;;  %v2804_v37 = vadd.f32 %v2552_v2, %v2541_v42  ;;  %v2808_v50 = vadd.f32 %v2552_v2, %v2545_v53 }
 0x231   :  { %3241 = vst [vmem:[#allocation23_spill] sm:$0xff] %v2800_v28  ;;  %v1317_v61 = vmax.f32 %v2560_v44, 0.0  ;;  %v1320_v13 = vmax.f32 %v2572_v0, 0.0  ;;  %v1322_v28 = vmax.f32 %v2580_v15, 0.0  ;;  %v1323_v42 = vmax.f32 %v2584_v43, 0.0  ;;  %1383 = vst.msk [vmem:[%s3134_s4 + $0x18] sm:$0xff] %vm835_vm0, %v1319_v14 }
 0x232   :  { %3237 = vst [vmem:[#allocation17_spill] sm:$0xff] %v2788_v20  ;;  %3239 = vst [vmem:[#allocation19_spill] sm:$0xff] %v2792_v6  ;;  %v1316_v20 = vmax.f32 %v2556_v19, 0.0  ;;  %v1318_v6 = vmax.f32 %v2564_v57, 0.0  ;;  %v1325_v2 = vmax.f32 %v2592_v29, 0.0  ;;  %v1326_v53 = vmax.f32 %v2596_v47, 0.0 }
 0x233   :  { %3242 = vst [vmem:[#allocation25_spill] sm:$0xff] %v2804_v37  ;;  %v1324_v37 = vmax.f32 %v2588_v54, 0.0  ;;  %v1327_v19 = vmax.f32 %v2600_v25, 0.0  ;;  %1381 = vst.msk [vmem:[%s3134_s4 + $0x8] sm:$0xff] %vm835_vm0, %v1317_v61  ;;  %v1328_v44 = vmax.f32 %v2604_v17, 0.0  ;;  %v1329_v57 = vmax.f32 %v2608_v22, 0.0 }
 0x234   :  { %1380 = vst.msk [vmem:[%s3134_s4] sm:$0xff] %vm835_vm0, %v1316_v20  ;;  %1382 = vst.msk [vmem:[%s3134_s4 + $0x10] sm:$0xff] %vm835_vm0, %v1318_v6  ;;  %v1330_v38 = vmax.f32 %v2612_v33, 0.0  ;;  %v1331_v0 = vmax.f32 %v2616_v40, 0.0  ;;  %v1332_v8 = vmax.f32 %v2620_v51, 0.0  ;;  %v1333_v15 = vmax.f32 %v2624_v58, 0.0 }
 0x235   :  { %1384 = vst.msk [vmem:[%s3134_s4 + $0x20] sm:$0xff] %vm835_vm0, %v1320_v13  ;;  %1385 = vst.msk [vmem:[%s3134_s4 + $0x28] sm:$0xff] %vm835_vm0, %v1321_v7  ;;  %v1334_v43 = vmax.f32 %v2628_v5, 0.0  ;;  %v1335_v54 = vmax.f32 %v2632_v12, 0.0  ;;  %v1336_v29 = vmax.f32 %v2636_v27, 0.0  ;;  %v1337_v47 = vmax.f32 %v2640_v36, 0.0 }
 0x236   :  { %1386 = vst.msk [vmem:[%s3134_s4 + $0x30] sm:$0xff] %vm835_vm0, %v1322_v28  ;;  %1387 = vst.msk [vmem:[%s3134_s4 + $0x38] sm:$0xff] %vm835_vm0, %v1323_v42  ;;  %v1338_v25 = vmax.f32 %v2644_v49, 0.0  ;;  %v1339_v17 = vmax.f32 %v2648_v9, 0.0  ;;  %v1340_v22 = vmax.f32 %v2652_v11, 0.0  ;;  %v1341_v33 = vmax.f32 %v2656_v56, 0.0 }
 0x237   :  { %1388 = vst.msk [vmem:[%s3134_s4 + $0x40] sm:$0xff] %vm835_vm0, %v1324_v37  ;;  %1389 = vst.msk [vmem:[%s3134_s4 + $0x48] sm:$0xff] %vm835_vm0, %v1325_v2  ;;  %v1342_v40 = vmax.f32 %v2660_v1, 0.0  ;;  %v1343_v51 = vmax.f32 %v2664_v63, 0.0  ;;  %v1344_v58 = vmax.f32 %v2668_v24, 0.0  ;;  %v1345_v5 = vmax.f32 %v2672_v35, 0.0 }
 0x238   :  { %1390 = vst.msk [vmem:[%s3134_s4 + $0x50] sm:$0xff] %vm835_vm0, %v1326_v53  ;;  %1391 = vst.msk [vmem:[%s3134_s4 + $0x58] sm:$0xff] %vm835_vm0, %v1327_v19  ;;  %v1346_v12 = vmax.f32 %v2676_v39, 0.0  ;;  %v1347_v27 = vmax.f32 %v2680_v48, 0.0  ;;  %v1348_v36 = vmax.f32 %v2684_v55, 0.0  ;;  %v1349_v49 = vmax.f32 %v2688_v46, 0.0 }
 0x239   :  { %1392 = vst.msk [vmem:[%s3134_s4 + $0x60] sm:$0xff] %vm835_vm0, %v1328_v44  ;;  %1393 = vst.msk [vmem:[%s3134_s4 + $0x68] sm:$0xff] %vm835_vm0, %v1329_v57  ;;  %v1350_v9 = vmax.f32 %v2692_v45, 0.0  ;;  %v1351_v11 = vmax.f32 %v2696_v3, 0.0  ;;  %v1352_v56 = vmax.f32 %v2700_v26, 0.0  ;;  %v1353_v1 = vmax.f32 %v2704_v32, 0.0 }
 0x23a   :  { %1394 = vst.msk [vmem:[%s3134_s4 + $0x70] sm:$0xff] %vm835_vm0, %v1330_v38  ;;  %1395 = vst.msk [vmem:[%s3134_s4 + $0x78] sm:$0xff] %vm835_vm0, %v1331_v0  ;;  %v1354_v63 = vmax.f32 %v2708_v62, 0.0  ;;  %v1355_v24 = vmax.f32 %v2712_v31, 0.0  ;;  %v1356_v35 = vmax.f32 %v2716_v16, 0.0  ;;  %v1357_v39 = vmax.f32 %v2720_v30, 0.0 }
 0x23b   :  { %1396 = vst.msk [vmem:[%s3134_s4 + $0x80] sm:$0xff] %vm835_vm0, %v1332_v8  ;;  %1397 = vst.msk [vmem:[%s3134_s4 + $0x88] sm:$0xff] %vm835_vm0, %v1333_v15  ;;  %v1358_v48 = vmax.f32 %v2724_v18, 0.0  ;;  %v1359_v55 = vmax.f32 %v2728_v23, 0.0  ;;  %v1360_v46 = vmax.f32 %v2732_v34, 0.0  ;;  %v1361_v45 = vmax.f32 %v2736_v41, 0.0 }
 0x23c   :  { %1398 = vst.msk [vmem:[%s3134_s4 + $0x90] sm:$0xff] %vm835_vm0, %v1334_v43  ;;  %1399 = vst.msk [vmem:[%s3134_s4 + $0x98] sm:$0xff] %vm835_vm0, %v1335_v54  ;;  %v1362_v3 = vmax.f32 %v2740_v52, 0.0  ;;  %v1363_v26 = vmax.f32 %v2744_v59, 0.0  ;;  %v3243_v32 = vld [vmem:[#allocation16_spill] sm:$0xff]  ;;  %v3244_v31 = vld [vmem:[#allocation18_spill] sm:$0xff] }
 0x23d   :  { %1400 = vst.msk [vmem:[%s3134_s4 + $0xa0] sm:$0xff] %vm835_vm0, %v1336_v29  ;;  %1401 = vst.msk [vmem:[%s3134_s4 + $0xa8] sm:$0xff] %vm835_vm0, %v1337_v47  ;;  %v1364_v62 = vmax.f32 %v3243_v32, 0.0  ;;  %v1365_v16 = vmax.f32 %v3244_v31, 0.0  ;;  %v3245_v30 = vld [vmem:[#allocation20_spill] sm:$0xff]  ;;  %v3246_v23 = vld [vmem:[#allocation22_spill] sm:$0xff] }
 0x23e   :  { %1402 = vst.msk [vmem:[%s3134_s4 + $0xb0] sm:$0xff] %vm835_vm0, %v1338_v25  ;;  %1403 = vst.msk [vmem:[%s3134_s4 + $0xb8] sm:$0xff] %vm835_vm0, %v1339_v17  ;;  %v1366_v18 = vmax.f32 %v3245_v30, 0.0  ;;  %v1367_v34 = vmax.f32 %v3246_v23, 0.0  ;;  %v3247_v41 = vld [vmem:[#allocation24_spill] sm:$0xff]  ;;  %v3248_v59 = vld [vmem:[#allocation26_spill] sm:$0xff] }
 0x23f   :  { %1404 = vst.msk [vmem:[%s3134_s4 + $0xc0] sm:$0xff] %vm835_vm0, %v1340_v22  ;;  %1405 = vst.msk [vmem:[%s3134_s4 + $0xc8] sm:$0xff] %vm835_vm0, %v1341_v33  ;;  %v1368_v52 = vmax.f32 %v3247_v41, 0.0  ;;  %v1369_v20 = vmax.f32 %v3248_v59, 0.0  ;;  %v1370_v6 = vmax.f32 %v2772_v10, 0.0  ;;  %v1371_v13 = vmax.f32 %v2776_v21, 0.0 }
 0x240   :  { %1406 = vst.msk [vmem:[%s3134_s4 + $0xd0] sm:$0xff] %vm835_vm0, %v1342_v40  ;;  %1407 = vst.msk [vmem:[%s3134_s4 + $0xd8] sm:$0xff] %vm835_vm0, %v1343_v51  ;;  %v1372_v10 = vmax.f32 %v2780_v4, 0.0  ;;  %v1373_v21 = vmax.f32 %v2784_v60, 0.0  ;;  %v3249_v28 = vld [vmem:[#allocation17_spill] sm:$0xff]  ;;  %v3250_v61 = vld [vmem:[#allocation19_spill] sm:$0xff] }
 0x241   :  { %1408 = vst.msk [vmem:[%s3134_s4 + $0xe0] sm:$0xff] %vm835_vm0, %v1344_v58  ;;  %1409 = vst.msk [vmem:[%s3134_s4 + $0xe8] sm:$0xff] %vm835_vm0, %v1345_v5  ;;  %v1374_v37 = vmax.f32 %v3249_v28, 0.0  ;;  %v1375_v14 = vmax.f32 %v3250_v61, 0.0  ;;  %v3251_v4 = vld [vmem:[#allocation21_spill] sm:$0xff]  ;;  %v3252_v7 = vld [vmem:[#allocation23_spill] sm:$0xff] }
 0x242   :  { %1410 = vst.msk [vmem:[%s3134_s4 + $0xf0] sm:$0xff] %vm835_vm0, %v1346_v12  ;;  %1411 = vst.msk [vmem:[%s3134_s4 + $0xf8] sm:$0xff] %vm835_vm0, %v1347_v27  ;;  %v1376_v60 = vmax.f32 %v3251_v4, 0.0  ;;  %v1377_v42 = vmax.f32 %v3252_v7, 0.0  ;;  %v3253_v2 = vld [vmem:[#allocation25_spill] sm:$0xff]  ;;  %v1379_v19 = vmax.f32 %v2808_v50, 0.0 }
 0x243   :  { %1412 = vst.msk [vmem:[%s3134_s4 + $0x100] sm:$0xff] %vm835_vm0, %v1348_v36  ;;  %1413 = vst.msk [vmem:[%s3134_s4 + $0x108] sm:$0xff] %vm835_vm0, %v1349_v49  ;;  %v1378_v53 = vmax.f32 %v3253_v2, 0.0 }
 0x244   :  { %1414 = vst.msk [vmem:[%s3134_s4 + $0x110] sm:$0xff] %vm835_vm0, %v1350_v9  ;;  %1415 = vst.msk [vmem:[%s3134_s4 + $0x118] sm:$0xff] %vm835_vm0, %v1351_v11 }
 0x245   :  { %1416 = vst.msk [vmem:[%s3134_s4 + $0x120] sm:$0xff] %vm835_vm0, %v1352_v56  ;;  %1417 = vst.msk [vmem:[%s3134_s4 + $0x128] sm:$0xff] %vm835_vm0, %v1353_v1 }
 0x246   :  { %1418 = vst.msk [vmem:[%s3134_s4 + $0x130] sm:$0xff] %vm835_vm0, %v1354_v63  ;;  %1419 = vst.msk [vmem:[%s3134_s4 + $0x138] sm:$0xff] %vm835_vm0, %v1355_v24 }
 0x247   :  { %1420 = vst.msk [vmem:[%s3134_s4 + $0x140] sm:$0xff] %vm835_vm0, %v1356_v35  ;;  %1421 = vst.msk [vmem:[%s3134_s4 + $0x148] sm:$0xff] %vm835_vm0, %v1357_v39 }
 0x248   :  { %1422 = vst.msk [vmem:[%s3134_s4 + $0x150] sm:$0xff] %vm835_vm0, %v1358_v48  ;;  %1423 = vst.msk [vmem:[%s3134_s4 + $0x158] sm:$0xff] %vm835_vm0, %v1359_v55 }
 0x249   :  { %1424 = vst.msk [vmem:[%s3134_s4 + $0x160] sm:$0xff] %vm835_vm0, %v1360_v46  ;;  %1425 = vst.msk [vmem:[%s3134_s4 + $0x168] sm:$0xff] %vm835_vm0, %v1361_v45 }
 0x24a   :  { %1426 = vst.msk [vmem:[%s3134_s4 + $0x170] sm:$0xff] %vm835_vm0, %v1362_v3  ;;  %1427 = vst.msk [vmem:[%s3134_s4 + $0x178] sm:$0xff] %vm835_vm0, %v1363_v26 }
 0x24b   :  { %1428 = vst.msk [vmem:[%s3134_s4 + $0x180] sm:$0xff] %vm835_vm0, %v1364_v62  ;;  %1429 = vst.msk [vmem:[%s3134_s4 + $0x188] sm:$0xff] %vm835_vm0, %v1365_v16 }
 0x24c   :  { %1430 = vst.msk [vmem:[%s3134_s4 + $0x190] sm:$0xff] %vm835_vm0, %v1366_v18  ;;  %1431 = vst.msk [vmem:[%s3134_s4 + $0x198] sm:$0xff] %vm835_vm0, %v1367_v34 }
 0x24d   :  { %1432 = vst.msk [vmem:[%s3134_s4 + $0x1a0] sm:$0xff] %vm835_vm0, %v1368_v52  ;;  %1433 = vst.msk [vmem:[%s3134_s4 + $0x1a8] sm:$0xff] %vm835_vm0, %v1369_v20 }
 0x24e   :  { %1434 = vst.msk [vmem:[%s3134_s4 + $0x1b0] sm:$0xff] %vm835_vm0, %v1370_v6  ;;  %1435 = vst.msk [vmem:[%s3134_s4 + $0x1b8] sm:$0xff] %vm835_vm0, %v1371_v13 }
 0x24f   :  { %1436 = vst.msk [vmem:[%s3134_s4 + $0x1c0] sm:$0xff] %vm835_vm0, %v1372_v10  ;;  %1437 = vst.msk [vmem:[%s3134_s4 + $0x1c8] sm:$0xff] %vm835_vm0, %v1373_v21 }
 0x250   :  { %1438 = vst.msk [vmem:[%s3134_s4 + $0x1d0] sm:$0xff] %vm835_vm0, %v1374_v37  ;;  %1439 = vst.msk [vmem:[%s3134_s4 + $0x1d8] sm:$0xff] %vm835_vm0, %v1375_v14 }
 0x251   :  { %1440 = vst.msk [vmem:[%s3134_s4 + $0x1e0] sm:$0xff] %vm835_vm0, %v1376_v60  ;;  %1441 = vst.msk [vmem:[%s3134_s4 + $0x1e8] sm:$0xff] %vm835_vm0, %v1377_v42 }
 0x252   :  { %1442 = vst.msk [vmem:[%s3134_s4 + $0x1f0] sm:$0xff] %vm835_vm0, %v1378_v53  ;;  %1443 = vst.msk [vmem:[%s3134_s4 + $0x1f8] sm:$0xff] %vm835_vm0, %v1379_v19 }
 0x253   :  { %1448 = vsyncpa [#allocation3], 1 }

</bundles_post_ra>
